<compile_context>
chip_gen: v6e
topology: v6e:2x2x1
jax: 0.10.0
libtpu: 0.0.40
codegen_flags: <defaults>
</compile_context>

<pallas_src>
import numpy as np
import jax
import jax.numpy as jnp
from jax.experimental import pallas as pl
from jax.experimental import pallas as pl  # noqa: F811 (kept single import path)
from jax.experimental.pallas import tpu as pltpu  # noqa: F401  (TPU backend; no pltpu-specific ops needed at this footprint)

# ----------------------------- problem sizes -------------------------------
NUM_AGENTS = 4
ACTION_DIM = 5
OBS_DIM = 6
X_DIM = 32                          # per-agent actor embedding dim (`x` input)
BASE_OUT = 32                       # output dim of the `base` net (Linear+tanh)
FATHER_DIM = NUM_AGENTS * (OBS_DIM + ACTION_DIM)
BATCH = 8
OUT_LANES = 128                     # lane-packed output slab width


# ------------------------------ Pallas kernel ------------------------------
def _act_forward_kernel(obs_ref, x_ref, avail_ref,
                        wobs_ref, wact_ref, bb_ref,
                        whx_ref, whh_ref, bh_ref,
                        mstep_ref, mact_ref, sel_ref, aoh_ref,
                        out_ref):
    B = out_ref.shape[0]
    N, A, H = NUM_AGENTS, ACTION_DIM, BASE_OUT
    NA = N * A
    NEG_HUGE = float(jnp.finfo(jnp.float32).min)   # strictly < -1e10 (keep ordering!)

    # ---------------- loop-invariant prologue (hoisted) ----------------
    # Per-agent obs projections via ONE block-diagonal matmul:
    #   obs_proj[:, n*H:(n+1)*H] = obs_n @ Wobs_n        (B, N*H) = (8, 128)
    obs_proj = jnp.dot(obs_ref[...], wobs_ref[...], preferred_element_type=jnp.float32)
    # Per-agent head x-logits via ONE block-diagonal matmul:
    #   xlog[:, n*A:(n+1)*A] = x_n @ Whx_n               (B, N*A)
    xlog = jnp.dot(x_ref[...], whx_ref[...], preferred_element_type=jnp.float32)
    bb_b = jnp.broadcast_to(bb_ref[...], (B, H))                 # base bias, broadcast once
    logits_base = xlog + jnp.broadcast_to(bh_ref[...], (B, NA))  # x-part + head bias
    avail_ok = avail_ref[...] > 0.0                              # (B, NA)
    iota = jax.lax.broadcasted_iota(jnp.int32, (B, NA), 1)

    # ---------------- value-carried accumulators (stored once) ----------------
    fa = jnp.zeros((B, NA), jnp.float32)        # father-action one-hots (agent-major)
    act_acc = jnp.zeros((B, N), jnp.float32)    # chosen action id per agent (exact ints)
    logp_acc = jnp.zeros((B, N), jnp.float32)   # log-prob of chosen action per agent

    # NOTE: accumulation assumes each topo row is a permutation of the agents
    # (each agent acts exactly once); guaranteed by topological_sorting upstream.

    # ---------------- fully-unrolled sequential DAG rollout ----------------
    for s in range(N):
        mstep = mstep_ref[s]    # (B, N)   parent mask G[:, acting_agent]
        mact = mact_ref[s]      # (B, NA)  parent mask repeated over the A action lanes
        sel = sel_ref[s]        # (B, NA)  acting-agent block-selection mask (flat logits)
        aoh = aoh_ref[s]        # (B, N)   acting-agent one-hot

        # base(father_oa): obs part = sum_n mask_n * (obs_n @ Wobs_n)  (pure VALU),
        # father-action part = (fa * mask) @ Wact  (one MXU push).
        obs_c = mstep[:, 0:1] * obs_proj[:, 0:H]
        for n in range(1, N):
            obs_c = obs_c + mstep[:, n:n + 1] * obs_proj[:, n * H:(n + 1) * H]
        h = jnp.tanh(obs_c + bb_b
                     + jnp.dot(fa * mact, wact_ref[...],
                               preferred_element_type=jnp.float32))

        # All agents' head logits at once (only the acting agent's block survives).
        logits_all = logits_base + jnp.dot(h, whh_ref[...],
                                           preferred_element_type=jnp.float32)
        logits = jnp.where(sel > 0.0,
                           jnp.where(avail_ok, logits_all, -1e10),
                           NEG_HUGE)

        maxv = jnp.max(logits, axis=-1, keepdims=True)
        # first-occurrence argmax over the flat NA lanes -> agent*A + action
        idx_flat = jnp.min(jnp.where(logits == maxv, iota, NA), axis=-1, keepdims=True)
        lse = maxv + jnp.log(jnp.sum(jnp.exp(logits - maxv), axis=-1, keepdims=True))
        logp = maxv - lse                                           # (B, 1)

        # Local action id = flat lane - acting agent's base lane.  Base lane comes
        # from the acting-agent one-hot (VALU mul-adds; no XLU reduction, no int div).
        base_lane = jnp.zeros((B, 1), jnp.float32)
        for n in range(1, N):
            base_lane = base_lane + aoh[:, n:n + 1] * float(n * A)
        action_f = idx_flat.astype(jnp.float32) - base_lane          # exact small int

        fa = fa + (iota == idx_flat).astype(jnp.float32)
        act_acc = act_acc + aoh * action_f
        logp_acc = logp_acc + aoh * logp
        # TODO(synk): stochastic sampling (deterministic=False) would add a Gumbel-max
        # draw here via pltpu.prng_seed + pltpu.prng_random_bits; only mode() is done.

    # Single lane-packed output slab: [actions | log-probs | father one-hots | pad].
    out_ref[...] = jnp.zeros(out_ref.shape, out_ref.dtype)
    out_ref[:, 0:N] = act_acc
    out_ref[:, N:2 * N] = logp_acc
    out_ref[:, 2 * N:2 * N + NA] = fa


def _build_pallas_forward(batch):
    # No grid: one kernel invocation, every operand fully VMEM-resident
    # (total footprint well under 0.5 MiB on v5e/v6e/v7x).
    return pl.pallas_call(
        _act_forward_kernel,
        out_shape=jax.ShapeDtypeStruct((batch, OUT_LANES), jnp.float32),
    )


# ----------------------- one-time parameter restructuring -------------------
def _block_diag(blocks):
    rows = sum(b.shape[0] for b in blocks)
    cols = sum(b.shape[1] for b in blocks)
    out = jnp.zeros((rows, cols), blocks[0].dtype)
    r = c = 0
    for b in blocks:
        out = out.at[r:r + b.shape[0], c:c + b.shape[1]].set(b)
        r += b.shape[0]
        c += b.shape[1]
    return out


def prepare_act_layer_params(base_w, base_b, head_wx, head_we, head_b):
    """Hoisted out of the jitted forward: done once per parameter set."""
    N, A, O = NUM_AGENTS, ACTION_DIM, OBS_DIM
    per = O + A
    obs_blocks = [base_w[n * per:n * per + O, :] for n in range(N)]          # (O, H) each
    act_blocks = [base_w[n * per + O:(n + 1) * per, :] for n in range(N)]    # (A, H) each
    w_obs_bd = _block_diag(obs_blocks)                                       # (N*O, N*H)
    w_act = jnp.concatenate(act_blocks, axis=0)                              # (N*A, H)
    whx_bd = _block_diag([head_wx[n] for n in range(N)])                     # (N*X, N*A)
    whh_s = jnp.concatenate([head_we[n] for n in range(N)], axis=-1)         # (H, N*A)
    bh_s = jnp.concatenate([head_b[n] for n in range(N)], axis=-1)           # (1, N*A)
    return (w_obs_bd, w_act, jnp.asarray(base_b), whx_bd, whh_s, bh_s)


# --------------------------- ACTLayer.forward (JAX) -------------------------
@jax.jit
def act_layer_forward(w_obs_bd, w_act, base_b, whx_bd, whh_s, bh_s,
                      obs, x, G_s, topo, avail):
    """Deterministic (mode) ACTLayer.forward for the Discrete branch.

    obs: (B,N,O), x: (B,N,X), G_s: (B,N,N) adjacency, topo: (B,N) int32 topological
    orders, avail: (B,A).  Returns actions (B*N,1) int32, log_probs (B*N,1) f32,
    one-hot father actions (B*N, N*A) f32.
    """
    B = obs.shape[0]
    N, A, O, X = NUM_AGENTS, ACTION_DIM, OBS_DIM, X_DIM
    NA = N * A

    # Per-step tensors, gathered once (single take_along_axis, no python-loop stacks).
    mask_steps = jnp.transpose(
        jnp.take_along_axis(G_s, topo[:, None, :], axis=2), (2, 0, 1)
    ).astype(jnp.float32)                                                   # (S, B, N)
    agent_oh = jax.nn.one_hot(jnp.transpose(topo), N, dtype=jnp.float32)    # (S, B, N)
    sel_mask = jnp.repeat(agent_oh, A, axis=-1)                             # (S, B, N*A)
    mask_act = jnp.repeat(mask_steps, A, axis=-1)                           # (S, B, N*A)
    obs_flat = obs.reshape(B, N * O)
    x_flat = x.reshape(B, N * X)
    avail_t = jnp.tile(avail, (1, N))                                       # (B, N*A)

    packed = _build_pallas_forward(B)(
        obs_flat, x_flat, avail_t, w_obs_bd, w_act, base_b,
        whx_bd, whh_s, bh_s, mask_steps, mask_act, sel_mask, agent_oh)

    actions = packed[:, 0:N].astype(jnp.int32).reshape(-1, 1)
    logps = packed[:, N:2 * N].reshape(-1, 1)
    fa = packed[:, 2 * N:2 * N + NA]
    fa_rep = jnp.broadcast_to(fa[:, None, :], (B, N, NA)).reshape(B * N, NA)
    return actions, logps, fa_rep


# -------------------------- numpy reference (module glue) -------------------
def _act_layer_forward_ref(params, obs, x, G_s, topo, available_actions=None):
    obs = np.asarray(obs, np.float32)
    x = np.asarray(x, np.float32)
    bz = obs.shape[0]
    N, A = NUM_AGENTS, ACTION_DIM
    actions = np.zeros((bz, N, 1), dtype=np.int64)
    logps = np.zeros((bz, N, 1), dtype=np.float32)
    base_w = np.asarray(params["base_w"]); base_b = np.asarray(params["base_b"])
    head_wx = np.asarray(params["head_wx"]); head_we = np.asarray(params["head_we"])
    head_b = np.asarray(params["head_b"])
    for step in range(N):
        indicies = {j: [] for j in range(N)}
        masks = {j: [] for j in range(N)}
        for i in range(bz):
            j = int(topo[i][step])
            indicies[j].append(i)
            masks[j].append(np.asarray(G_s[i])[:, j])
        for agent_id in range(N):
            idxs = indicies[agent_id]
            if not idxs:
                continue
            sel = np.asarray(idxs)
            masks_i = np.stack(masks[agent_id], axis=0).astype(np.float32)
            father_act = actions[sel]
            fa_onehot = np.eye(A, dtype=np.float32)[father_act.reshape(-1)]
            fa_onehot = fa_onehot.reshape(len(idxs), N, A)
            father_oa = np.concatenate([obs[sel], fa_onehot], axis=2)
            father_oa = father_oa * masks_i[:, :, None]
            father_oa = father_oa.reshape(len(idxs), -1)
            x_i = x[sel, agent_id, :]
            if available_actions is None:
                av = np.ones((len(idxs), A), dtype=np.float32)
            else:
                av = np.asarray(available_actions, np.float32)[sel]
            h = np.tanh(father_oa @ base_w + base_b)
            logits = x_i @ head_wx[agent_id] + h @ head_we[agent_id] + head_b[agent_id]
            logits = np.where(av > 0.0, logits, -1e10).astype(np.float32)
            act_g = np.argmax(logits, axis=-1, keepdims=True)
            maxv = np.max(logits, axis=-1, keepdims=True)
            lse = maxv + np.log(np.sum(np.exp(logits - maxv), axis=-1, keepdims=True))
            logp_g = np.take_along_axis(logits, act_g, axis=-1) - lse
            actions[sel, agent_id, :] = act_g
            logps[sel, agent_id, :] = logp_g
    fa = np.eye(A, dtype=np.float32)[actions.reshape(-1)]
    fa = fa.reshape(bz, 1, N * A)
    fa = np.repeat(fa, N, axis=1)
    return (actions.reshape(-1, 1).astype(np.int32),
            logps.reshape(-1, 1),
            fa.reshape(-1, N * A))


# ------------------------------- main ---------------------------------------
if __name__ == "__main__":
    key = jax.random.PRNGKey(0)
    ks = jax.random.split(key, 8)

    params = {
        "base_w": jax.random.normal(ks[0], (FATHER_DIM, BASE_OUT), jnp.float32) * 0.1,
        "base_b": jax.random.normal(ks[1], (1, BASE_OUT), jnp.float32) * 0.1,
        "head_wx": jax.random.normal(ks[2], (NUM_AGENTS, X_DIM, ACTION_DIM), jnp.float32) * 0.1,
        "head_we": jax.random.normal(ks[3], (NUM_AGENTS, BASE_OUT, ACTION_DIM), jnp.float32) * 0.1,
        "head_b": jax.random.normal(ks[4], (NUM_AGENTS, 1, ACTION_DIM), jnp.float32) * 0.1,
    }
    obs = jax.random.normal(ks[5], (BATCH, NUM_AGENTS, OBS_DIM), jnp.float32)
    x = jax.random.normal(ks[6], (BATCH, NUM_AGENTS, X_DIM), jnp.float32)

    # Deterministic per-sample DAGs: pick a permutation (= topological order),
    # then keep random forward edges along that order.
    rng = np.random.RandomState(0)
    perm_choices = [np.array([0, 1, 2, 3]), np.array([2, 0, 3, 1])]
    topo_np, G_np = [], []
    for i in range(BATCH):
        perm = perm_choices[i % 2]
        G = np.zeros((NUM_AGENTS, NUM_AGENTS), dtype=np.float32)
        for a in range(NUM_AGENTS):
            for b in range(a + 1, NUM_AGENTS):
                if rng.rand() < 0.7:
                    G[perm[a], perm[b]] = 1.0
        topo_np.append(perm)
        G_np.append(G)
    topo_np = np.stack(topo_np).astype(np.int32)     # (B, N)
    G_np = np.stack(G_np).astype(np.float32)         # (B, N, N)
    # Kernel accumulators assume each topo row is a permutation (agent acts once).
    assert all(sorted(r.tolist()) == list(range(NUM_AGENTS)) for r in topo_np)
    avail = jnp.ones((BATCH, ACTION_DIM), jnp.float32)

    prepped = prepare_act_layer_params(
        params["base_w"], params["base_b"], params["head_wx"],
        params["head_we"], params["head_b"])

    acts, logps, fa = act_layer_forward(
        *prepped, obs, x, jnp.asarray(G_np), jnp.asarray(topo_np), avail)
    acts, logps, fa = jax.block_until_ready((acts, logps, fa))

    acts_ref, logps_ref, fa_ref = _act_layer_forward_ref(
        {k: np.asarray(v) for k, v in params.items()},
        np.asarray(obs), np.asarray(x), G_np, topo_np, None)

    acts_np = np.asarray(acts)
    logps_np = np.asarray(logps)
    fa_np = np.asarray(fa)
    assert acts_np.shape == (BATCH * NUM_AGENTS, 1)
    assert logps_np.shape == (BATCH * NUM_AGENTS, 1)
    assert fa_np.shape == (BATCH * NUM_AGENTS, NUM_AGENTS * ACTION_DIM)
    assert np.array_equal(acts_np, acts_ref), "action mismatch vs reference"
    assert np.allclose(logps_np, logps_ref, atol=2e-3, rtol=2e-3), "logp mismatch"
    assert np.array_equal(fa_np, fa_ref), "one-hot mismatch"

    print("KERNEL_OK")
</pallas_src>

<mosaic_0001>
module attributes {stable_mosaic.version = 11 : i64} {
  func.func @_act_forward_kernel(%arg0: memref<8x24xf32, #tpu.memory_space<vmem>>, %arg1: memref<8x128xf32, #tpu.memory_space<vmem>>, %arg2: memref<8x20xf32, #tpu.memory_space<vmem>>, %arg3: memref<24x128xf32, #tpu.memory_space<vmem>>, %arg4: memref<20x32xf32, #tpu.memory_space<vmem>>, %arg5: memref<1x32xf32, #tpu.memory_space<vmem>>, %arg6: memref<128x20xf32, #tpu.memory_space<vmem>>, %arg7: memref<32x20xf32, #tpu.memory_space<vmem>>, %arg8: memref<1x20xf32, #tpu.memory_space<vmem>>, %arg9: memref<4x8x4xf32, #tpu.memory_space<vmem>>, %arg10: memref<4x8x20xf32, #tpu.memory_space<vmem>>, %arg11: memref<4x8x20xf32, #tpu.memory_space<vmem>>, %arg12: memref<4x8x4xf32, #tpu.memory_space<vmem>>, %arg13: memref<8x128xf32, #tpu.memory_space<vmem>>) attributes {dimension_semantics = [], scalar_prefetch = 0 : i64, scratch_operands = 0 : i64, tpu.core_type = #tpu.core_type<tc>} {
    %c0 = arith.constant 0 : index
    %c0_0 = arith.constant 0 : index
    %0 = vector.load %arg0[%c0, %c0_0] : memref<8x24xf32, #tpu.memory_space<vmem>>, vector<8x24xf32>
    %c0_1 = arith.constant 0 : index
    %c0_2 = arith.constant 0 : index
    %1 = vector.load %arg3[%c0_1, %c0_2] : memref<24x128xf32, #tpu.memory_space<vmem>>, vector<24x128xf32>
    %cst = arith.constant dense<0.000000e+00> : vector<8x128xf32>
    %2 = tpu.matmul %0, %1, %cst {dimension_numbers = #tpu.dot_dimension_numbers<[1], [0], [0], [1], [0, 0, 1, 1], [], []>} : vector<8x24xf32>, vector<24x128xf32>, vector<8x128xf32> -> vector<8x128xf32>
    %c0_3 = arith.constant 0 : index
    %c0_4 = arith.constant 0 : index
    %3 = vector.load %arg1[%c0_3, %c0_4] : memref<8x128xf32, #tpu.memory_space<vmem>>, vector<8x128xf32>
    %c0_5 = arith.constant 0 : index
    %c0_6 = arith.constant 0 : index
    %4 = vector.load %arg6[%c0_5, %c0_6] : memref<128x20xf32, #tpu.memory_space<vmem>>, vector<128x20xf32>
    %cst_7 = arith.constant dense<0.000000e+00> : vector<8x20xf32>
    %5 = tpu.matmul %3, %4, %cst_7 {dimension_numbers = #tpu.dot_dimension_numbers<[1], [0], [0], [1], [0, 0, 1, 1], [], []>} : vector<8x128xf32>, vector<128x20xf32>, vector<8x20xf32> -> vector<8x20xf32>
    %c0_8 = arith.constant 0 : index
    %c0_9 = arith.constant 0 : index
    %6 = vector.load %arg5[%c0_8, %c0_9] : memref<1x32xf32, #tpu.memory_space<vmem>>, vector<1x32xf32>
    %7 = vector.shape_cast %6 : vector<1x32xf32> to vector<1x32xf32>
    %8 = vector.broadcast %7 : vector<1x32xf32> to vector<8x32xf32>
    %c0_10 = arith.constant 0 : index
    %c0_11 = arith.constant 0 : index
    %9 = vector.load %arg8[%c0_10, %c0_11] : memref<1x20xf32, #tpu.memory_space<vmem>>, vector<1x20xf32>
    %10 = vector.shape_cast %9 : vector<1x20xf32> to vector<1x20xf32>
    %11 = vector.broadcast %10 : vector<1x20xf32> to vector<8x20xf32>
    %12 = arith.addf %5, %11 : vector<8x20xf32>
    %c0_12 = arith.constant 0 : index
    %c0_13 = arith.constant 0 : index
    %13 = vector.load %arg2[%c0_12, %c0_13] : memref<8x20xf32, #tpu.memory_space<vmem>>, vector<8x20xf32>
    %cst_14 = arith.constant 0.000000e+00 : f32
    %14 = vector.broadcast %cst_14 : f32 to vector<8x20xf32>
    %15 = arith.cmpf ogt, %13, %14 : vector<8x20xf32>
    %16 = tpu.iota {dimensions = array<i32: 1>} : vector<8x20xi32>
    %cst_15 = arith.constant 0.000000e+00 : f32
    %17 = vector.broadcast %cst_15 : f32 to vector<8x20xf32>
    %cst_16 = arith.constant 0.000000e+00 : f32
    %18 = vector.broadcast %cst_16 : f32 to vector<8x4xf32>
    %cst_17 = arith.constant 0.000000e+00 : f32
    %19 = vector.broadcast %cst_17 : f32 to vector<8x4xf32>
    %c0_18 = arith.constant 0 : index
    %c0_19 = arith.constant 0 : index
    %c0_20 = arith.constant 0 : index
    %20 = vector.load %arg9[%c0_18, %c0_19, %c0_20] : memref<4x8x4xf32, #tpu.memory_space<vmem>>, vector<1x8x4xf32>
    %21 = vector.shape_cast %20 : vector<1x8x4xf32> to vector<8x4xf32>
    %c0_21 = arith.constant 0 : index
    %c0_22 = arith.constant 0 : index
    %c0_23 = arith.constant 0 : index
    %22 = vector.load %arg10[%c0_21, %c0_22, %c0_23] : memref<4x8x20xf32, #tpu.memory_space<vmem>>, vector<1x8x20xf32>
    %23 = vector.shape_cast %22 : vector<1x8x20xf32> to vector<8x20xf32>
    %c0_24 = arith.constant 0 : index
    %c0_25 = arith.constant 0 : index
    %c0_26 = arith.constant 0 : index
    %24 = vector.load %arg11[%c0_24, %c0_25, %c0_26] : memref<4x8x20xf32, #tpu.memory_space<vmem>>, vector<1x8x20xf32>
    %25 = vector.shape_cast %24 : vector<1x8x20xf32> to vector<8x20xf32>
    %c0_27 = arith.constant 0 : index
    %c0_28 = arith.constant 0 : index
    %c0_29 = arith.constant 0 : index
    %26 = vector.load %arg12[%c0_27, %c0_28, %c0_29] : memref<4x8x4xf32, #tpu.memory_space<vmem>>, vector<1x8x4xf32>
    %27 = vector.shape_cast %26 : vector<1x8x4xf32> to vector<8x4xf32>
    %28 = vector.extract_strided_slice %21 {offsets = [0, 0], sizes = [8, 1], strides = [1, 1]} : vector<8x4xf32> to vector<8x1xf32>
    %29 = vector.extract_strided_slice %2 {offsets = [0, 0], sizes = [8, 32], strides = [1, 1]} : vector<8x128xf32> to vector<8x32xf32>
    %30 = vector.broadcast %28 : vector<8x1xf32> to vector<8x32xf32>
    %31 = arith.mulf %30, %29 : vector<8x32xf32>
    %32 = vector.extract_strided_slice %21 {offsets = [0, 1], sizes = [8, 1], strides = [1, 1]} : vector<8x4xf32> to vector<8x1xf32>
    %33 = vector.extract_strided_slice %2 {offsets = [0, 32], sizes = [8, 32], strides = [1, 1]} : vector<8x128xf32> to vector<8x32xf32>
    %34 = vector.broadcast %32 : vector<8x1xf32> to vector<8x32xf32>
    %35 = arith.mulf %34, %33 : vector<8x32xf32>
    %36 = arith.addf %31, %35 : vector<8x32xf32>
    %37 = vector.extract_strided_slice %21 {offsets = [0, 2], sizes = [8, 1], strides = [1, 1]} : vector<8x4xf32> to vector<8x1xf32>
    %38 = vector.extract_strided_slice %2 {offsets = [0, 64], sizes = [8, 32], strides = [1, 1]} : vector<8x128xf32> to vector<8x32xf32>
    %39 = vector.broadcast %37 : vector<8x1xf32> to vector<8x32xf32>
    %40 = arith.mulf %39, %38 : vector<8x32xf32>
    %41 = arith.addf %36, %40 : vector<8x32xf32>
    %42 = vector.extract_strided_slice %21 {offsets = [0, 3], sizes = [8, 1], strides = [1, 1]} : vector<8x4xf32> to vector<8x1xf32>
    %43 = vector.extract_strided_slice %2 {offsets = [0, 96], sizes = [8, 32], strides = [1, 1]} : vector<8x128xf32> to vector<8x32xf32>
    %44 = vector.broadcast %42 : vector<8x1xf32> to vector<8x32xf32>
    %45 = arith.mulf %44, %43 : vector<8x32xf32>
    %46 = arith.addf %41, %45 : vector<8x32xf32>
    %47 = arith.addf %46, %8 : vector<8x32xf32>
    %48 = arith.mulf %17, %23 : vector<8x20xf32>
    %c0_30 = arith.constant 0 : index
    %c0_31 = arith.constant 0 : index
    %49 = vector.load %arg4[%c0_30, %c0_31] : memref<20x32xf32, #tpu.memory_space<vmem>>, vector<20x32xf32>
    %cst_32 = arith.constant dense<0.000000e+00> : vector<8x32xf32>
    %50 = tpu.matmul %48, %49, %cst_32 {dimension_numbers = #tpu.dot_dimension_numbers<[1], [0], [0], [1], [0, 0, 1, 1], [], []>} : vector<8x20xf32>, vector<20x32xf32>, vector<8x32xf32> -> vector<8x32xf32>
    %51 = arith.addf %47, %50 : vector<8x32xf32>
    %52 = math.tanh %51 : vector<8x32xf32>
    %c0_33 = arith.constant 0 : index
    %c0_34 = arith.constant 0 : index
    %53 = vector.load %arg7[%c0_33, %c0_34] : memref<32x20xf32, #tpu.memory_space<vmem>>, vector<32x20xf32>
    %cst_35 = arith.constant dense<0.000000e+00> : vector<8x20xf32>
    %54 = tpu.matmul %52, %53, %cst_35 {dimension_numbers = #tpu.dot_dimension_numbers<[1], [0], [0], [1], [0, 0, 1, 1], [], []>} : vector<8x32xf32>, vector<32x20xf32>, vector<8x20xf32> -> vector<8x20xf32>
    %55 = arith.addf %12, %54 : vector<8x20xf32>
    %cst_36 = arith.constant 0.000000e+00 : f32
    %56 = vector.broadcast %cst_36 : f32 to vector<8x20xf32>
    %57 = arith.cmpf ogt, %25, %56 : vector<8x20xf32>
    %cst_37 = arith.constant -1.000000e+10 : f32
    %58 = vector.broadcast %cst_37 : f32 to vector<8x20xf32>
    %59 = arith.select %15, %55, %58 : vector<8x20xi1>, vector<8x20xf32>
    %cst_38 = arith.constant -3.40282347E+38 : f32
    %60 = vector.broadcast %cst_38 : f32 to vector<8x20xf32>
    %61 = arith.select %57, %59, %60 : vector<8x20xi1>, vector<8x20xf32>
    %cst_39 = arith.constant dense<0xFF800000> : vector<8xf32>
    %62 = vector.multi_reduction <maximumf>, %61, %cst_39 [1] : vector<8x20xf32> to vector<8xf32>
    %63 = vector.shape_cast %62 : vector<8xf32> to vector<8x1xf32>
    %64 = vector.broadcast %63 : vector<8x1xf32> to vector<8x20xf32>
    %65 = arith.cmpf oeq, %61, %64 : vector<8x20xf32>
    %c20_i32 = arith.constant 20 : i32
    %66 = vector.broadcast %c20_i32 : i32 to vector<8x20xi32>
    %67 = arith.select %65, %16, %66 : vector<8x20xi1>, vector<8x20xi32>
    %cst_40 = arith.constant dense<2147483647> : vector<8xi32>
    %68 = vector.multi_reduction <minsi>, %67, %cst_40 [1] : vector<8x20xi32> to vector<8xi32>
    %69 = vector.shape_cast %68 : vector<8xi32> to vector<8x1xi32>
    %70 = vector.broadcast %63 : vector<8x1xf32> to vector<8x20xf32>
    %71 = arith.subf %61, %70 : vector<8x20xf32>
    %72 = math.exp %71 : vector<8x20xf32>
    %cst_41 = arith.constant dense<0.000000e+00> : vector<8xf32>
    %73 = vector.multi_reduction <add>, %72, %cst_41 [1] : vector<8x20xf32> to vector<8xf32>
    %74 = vector.shape_cast %73 : vector<8xf32> to vector<8x1xf32>
    %75 = math.log %74 : vector<8x1xf32>
    %76 = arith.addf %63, %75 : vector<8x1xf32>
    %77 = arith.subf %63, %76 : vector<8x1xf32>
    %cst_42 = arith.constant 0.000000e+00 : f32
    %78 = vector.broadcast %cst_42 : f32 to vector<8x1xf32>
    %79 = vector.extract_strided_slice %27 {offsets = [0, 1], sizes = [8, 1], strides = [1, 1]} : vector<8x4xf32> to vector<8x1xf32>
    %cst_43 = arith.constant 5.000000e+00 : f32
    %80 = vector.broadcast %cst_43 : f32 to vector<8x1xf32>
    %81 = arith.mulf %79, %80 : vector<8x1xf32>
    %82 = arith.addf %78, %81 : vector<8x1xf32>
    %83 = vector.extract_strided_slice %27 {offsets = [0, 2], sizes = [8, 1], strides = [1, 1]} : vector<8x4xf32> to vector<8x1xf32>
    %cst_44 = arith.constant 1.000000e+01 : f32
    %84 = vector.broadcast %cst_44 : f32 to vector<8x1xf32>
    %85 = arith.mulf %83, %84 : vector<8x1xf32>
    %86 = arith.addf %82, %85 : vector<8x1xf32>
    %87 = vector.extract_strided_slice %27 {offsets = [0, 3], sizes = [8, 1], strides = [1, 1]} : vector<8x4xf32> to vector<8x1xf32>
    %cst_45 = arith.constant 1.500000e+01 : f32
    %88 = vector.broadcast %cst_45 : f32 to vector<8x1xf32>
    %89 = arith.mulf %87, %88 : vector<8x1xf32>
    %90 = arith.addf %86, %89 : vector<8x1xf32>
    %91 = arith.sitofp %69 : vector<8x1xi32> to vector<8x1xf32>
    %92 = arith.subf %91, %90 : vector<8x1xf32>
    %93 = vector.broadcast %69 : vector<8x1xi32> to vector<8x20xi32>
    %94 = arith.cmpi eq, %16, %93 : vector<8x20xi32>
    %95 = arith.extui %94 : vector<8x20xi1> to vector<8x20xi32>
    %96 = arith.sitofp %95 : vector<8x20xi32> to vector<8x20xf32>
    %97 = arith.addf %17, %96 : vector<8x20xf32>
    %98 = vector.broadcast %92 : vector<8x1xf32> to vector<8x4xf32>
    %99 = arith.mulf %27, %98 : vector<8x4xf32>
    %100 = arith.addf %18, %99 : vector<8x4xf32>
    %101 = vector.broadcast %77 : vector<8x1xf32> to vector<8x4xf32>
    %102 = arith.mulf %27, %101 : vector<8x4xf32>
    %103 = arith.addf %19, %102 : vector<8x4xf32>
    %c1 = arith.constant 1 : index
    %c0_46 = arith.constant 0 : index
    %c0_47 = arith.constant 0 : index
    %104 = vector.load %arg9[%c1, %c0_46, %c0_47] : memref<4x8x4xf32, #tpu.memory_space<vmem>>, vector<1x8x4xf32>
    %105 = vector.shape_cast %104 : vector<1x8x4xf32> to vector<8x4xf32>
    %c1_48 = arith.constant 1 : index
    %c0_49 = arith.constant 0 : index
    %c0_50 = arith.constant 0 : index
    %106 = vector.load %arg10[%c1_48, %c0_49, %c0_50] : memref<4x8x20xf32, #tpu.memory_space<vmem>>, vector<1x8x20xf32>
    %107 = vector.shape_cast %106 : vector<1x8x20xf32> to vector<8x20xf32>
    %c1_51 = arith.constant 1 : index
    %c0_52 = arith.constant 0 : index
    %c0_53 = arith.constant 0 : index
    %108 = vector.load %arg11[%c1_51, %c0_52, %c0_53] : memref<4x8x20xf32, #tpu.memory_space<vmem>>, vector<1x8x20xf32>
    %109 = vector.shape_cast %108 : vector<1x8x20xf32> to vector<8x20xf32>
    %c1_54 = arith.constant 1 : index
    %c0_55 = arith.constant 0 : index
    %c0_56 = arith.constant 0 : index
    %110 = vector.load %arg12[%c1_54, %c0_55, %c0_56] : memref<4x8x4xf32, #tpu.memory_space<vmem>>, vector<1x8x4xf32>
    %111 = vector.shape_cast %110 : vector<1x8x4xf32> to vector<8x4xf32>
    %112 = vector.extract_strided_slice %105 {offsets = [0, 0], sizes = [8, 1], strides = [1, 1]} : vector<8x4xf32> to vector<8x1xf32>
    %113 = vector.extract_strided_slice %2 {offsets = [0, 0], sizes = [8, 32], strides = [1, 1]} : vector<8x128xf32> to vector<8x32xf32>
    %114 = vector.broadcast %112 : vector<8x1xf32> to vector<8x32xf32>
    %115 = arith.mulf %114, %113 : vector<8x32xf32>
    %116 = vector.extract_strided_slice %105 {offsets = [0, 1], sizes = [8, 1], strides = [1, 1]} : vector<8x4xf32> to vector<8x1xf32>
    %117 = vector.extract_strided_slice %2 {offsets = [0, 32], sizes = [8, 32], strides = [1, 1]} : vector<8x128xf32> to vector<8x32xf32>
    %118 = vector.broadcast %116 : vector<8x1xf32> to vector<8x32xf32>
    %119 = arith.mulf %118, %117 : vector<8x32xf32>
    %120 = arith.addf %115, %119 : vector<8x32xf32>
    %121 = vector.extract_strided_slice %105 {offsets = [0, 2], sizes = [8, 1], strides = [1, 1]} : vector<8x4xf32> to vector<8x1xf32>
    %122 = vector.extract_strided_slice %2 {offsets = [0, 64], sizes = [8, 32], strides = [1, 1]} : vector<8x128xf32> to vector<8x32xf32>
    %123 = vector.broadcast %121 : vector<8x1xf32> to vector<8x32xf32>
    %124 = arith.mulf %123, %122 : vector<8x32xf32>
    %125 = arith.addf %120, %124 : vector<8x32xf32>
    %126 = vector.extract_strided_slice %105 {offsets = [0, 3], sizes = [8, 1], strides = [1, 1]} : vector<8x4xf32> to vector<8x1xf32>
    %127 = vector.extract_strided_slice %2 {offsets = [0, 96], sizes = [8, 32], strides = [1, 1]} : vector<8x128xf32> to vector<8x32xf32>
    %128 = vector.broadcast %126 : vector<8x1xf32> to vector<8x32xf32>
    %129 = arith.mulf %128, %127 : vector<8x32xf32>
    %130 = arith.addf %125, %129 : vector<8x32xf32>
    %131 = arith.addf %130, %8 : vector<8x32xf32>
    %132 = arith.mulf %97, %107 : vector<8x20xf32>
    %c0_57 = arith.constant 0 : index
    %c0_58 = arith.constant 0 : index
    %133 = vector.load %arg4[%c0_57, %c0_58] : memref<20x32xf32, #tpu.memory_space<vmem>>, vector<20x32xf32>
    %cst_59 = arith.constant dense<0.000000e+00> : vector<8x32xf32>
    %134 = tpu.matmul %132, %133, %cst_59 {dimension_numbers = #tpu.dot_dimension_numbers<[1], [0], [0], [1], [0, 0, 1, 1], [], []>} : vector<8x20xf32>, vector<20x32xf32>, vector<8x32xf32> -> vector<8x32xf32>
    %135 = arith.addf %131, %134 : vector<8x32xf32>
    %136 = math.tanh %135 : vector<8x32xf32>
    %c0_60 = arith.constant 0 : index
    %c0_61 = arith.constant 0 : index
    %137 = vector.load %arg7[%c0_60, %c0_61] : memref<32x20xf32, #tpu.memory_space<vmem>>, vector<32x20xf32>
    %cst_62 = arith.constant dense<0.000000e+00> : vector<8x20xf32>
    %138 = tpu.matmul %136, %137, %cst_62 {dimension_numbers = #tpu.dot_dimension_numbers<[1], [0], [0], [1], [0, 0, 1, 1], [], []>} : vector<8x32xf32>, vector<32x20xf32>, vector<8x20xf32> -> vector<8x20xf32>
    %139 = arith.addf %12, %138 : vector<8x20xf32>
    %cst_63 = arith.constant 0.000000e+00 : f32
    %140 = vector.broadcast %cst_63 : f32 to vector<8x20xf32>
    %141 = arith.cmpf ogt, %109, %140 : vector<8x20xf32>
    %cst_64 = arith.constant -1.000000e+10 : f32
    %142 = vector.broadcast %cst_64 : f32 to vector<8x20xf32>
    %143 = arith.select %15, %139, %142 : vector<8x20xi1>, vector<8x20xf32>
    %cst_65 = arith.constant -3.40282347E+38 : f32
    %144 = vector.broadcast %cst_65 : f32 to vector<8x20xf32>
    %145 = arith.select %141, %143, %144 : vector<8x20xi1>, vector<8x20xf32>
    %cst_66 = arith.constant dense<0xFF800000> : vector<8xf32>
    %146 = vector.multi_reduction <maximumf>, %145, %cst_66 [1] : vector<8x20xf32> to vector<8xf32>
    %147 = vector.shape_cast %146 : vector<8xf32> to vector<8x1xf32>
    %148 = vector.broadcast %147 : vector<8x1xf32> to vector<8x20xf32>
    %149 = arith.cmpf oeq, %145, %148 : vector<8x20xf32>
    %c20_i32_67 = arith.constant 20 : i32
    %150 = vector.broadcast %c20_i32_67 : i32 to vector<8x20xi32>
    %151 = arith.select %149, %16, %150 : vector<8x20xi1>, vector<8x20xi32>
    %cst_68 = arith.constant dense<2147483647> : vector<8xi32>
    %152 = vector.multi_reduction <minsi>, %151, %cst_68 [1] : vector<8x20xi32> to vector<8xi32>
    %153 = vector.shape_cast %152 : vector<8xi32> to vector<8x1xi32>
    %154 = vector.broadcast %147 : vector<8x1xf32> to vector<8x20xf32>
    %155 = arith.subf %145, %154 : vector<8x20xf32>
    %156 = math.exp %155 : vector<8x20xf32>
    %cst_69 = arith.constant dense<0.000000e+00> : vector<8xf32>
    %157 = vector.multi_reduction <add>, %156, %cst_69 [1] : vector<8x20xf32> to vector<8xf32>
    %158 = vector.shape_cast %157 : vector<8xf32> to vector<8x1xf32>
    %159 = math.log %158 : vector<8x1xf32>
    %160 = arith.addf %147, %159 : vector<8x1xf32>
    %161 = arith.subf %147, %160 : vector<8x1xf32>
    %cst_70 = arith.constant 0.000000e+00 : f32
    %162 = vector.broadcast %cst_70 : f32 to vector<8x1xf32>
    %163 = vector.extract_strided_slice %111 {offsets = [0, 1], sizes = [8, 1], strides = [1, 1]} : vector<8x4xf32> to vector<8x1xf32>
    %cst_71 = arith.constant 5.000000e+00 : f32
    %164 = vector.broadcast %cst_71 : f32 to vector<8x1xf32>
    %165 = arith.mulf %163, %164 : vector<8x1xf32>
    %166 = arith.addf %162, %165 : vector<8x1xf32>
    %167 = vector.extract_strided_slice %111 {offsets = [0, 2], sizes = [8, 1], strides = [1, 1]} : vector<8x4xf32> to vector<8x1xf32>
    %cst_72 = arith.constant 1.000000e+01 : f32
    %168 = vector.broadcast %cst_72 : f32 to vector<8x1xf32>
    %169 = arith.mulf %167, %168 : vector<8x1xf32>
    %170 = arith.addf %166, %169 : vector<8x1xf32>
    %171 = vector.extract_strided_slice %111 {offsets = [0, 3], sizes = [8, 1], strides = [1, 1]} : vector<8x4xf32> to vector<8x1xf32>
    %cst_73 = arith.constant 1.500000e+01 : f32
    %172 = vector.broadcast %cst_73 : f32 to vector<8x1xf32>
    %173 = arith.mulf %171, %172 : vector<8x1xf32>
    %174 = arith.addf %170, %173 : vector<8x1xf32>
    %175 = arith.sitofp %153 : vector<8x1xi32> to vector<8x1xf32>
    %176 = arith.subf %175, %174 : vector<8x1xf32>
    %177 = vector.broadcast %153 : vector<8x1xi32> to vector<8x20xi32>
    %178 = arith.cmpi eq, %16, %177 : vector<8x20xi32>
    %179 = arith.extui %178 : vector<8x20xi1> to vector<8x20xi32>
    %180 = arith.sitofp %179 : vector<8x20xi32> to vector<8x20xf32>
    %181 = arith.addf %97, %180 : vector<8x20xf32>
    %182 = vector.broadcast %176 : vector<8x1xf32> to vector<8x4xf32>
    %183 = arith.mulf %111, %182 : vector<8x4xf32>
    %184 = arith.addf %100, %183 : vector<8x4xf32>
    %185 = vector.broadcast %161 : vector<8x1xf32> to vector<8x4xf32>
    %186 = arith.mulf %111, %185 : vector<8x4xf32>
    %187 = arith.addf %103, %186 : vector<8x4xf32>
    %c2 = arith.constant 2 : index
    %c0_74 = arith.constant 0 : index
    %c0_75 = arith.constant 0 : index
    %188 = vector.load %arg9[%c2, %c0_74, %c0_75] : memref<4x8x4xf32, #tpu.memory_space<vmem>>, vector<1x8x4xf32>
    %189 = vector.shape_cast %188 : vector<1x8x4xf32> to vector<8x4xf32>
    %c2_76 = arith.constant 2 : index
    %c0_77 = arith.constant 0 : index
    %c0_78 = arith.constant 0 : index
    %190 = vector.load %arg10[%c2_76, %c0_77, %c0_78] : memref<4x8x20xf32, #tpu.memory_space<vmem>>, vector<1x8x20xf32>
    %191 = vector.shape_cast %190 : vector<1x8x20xf32> to vector<8x20xf32>
    %c2_79 = arith.constant 2 : index
    %c0_80 = arith.constant 0 : index
    %c0_81 = arith.constant 0 : index
    %192 = vector.load %arg11[%c2_79, %c0_80, %c0_81] : memref<4x8x20xf32, #tpu.memory_space<vmem>>, vector<1x8x20xf32>
    %193 = vector.shape_cast %192 : vector<1x8x20xf32> to vector<8x20xf32>
    %c2_82 = arith.constant 2 : index
    %c0_83 = arith.constant 0 : index
    %c0_84 = arith.constant 0 : index
    %194 = vector.load %arg12[%c2_82, %c0_83, %c0_84] : memref<4x8x4xf32, #tpu.memory_space<vmem>>, vector<1x8x4xf32>
    %195 = vector.shape_cast %194 : vector<1x8x4xf32> to vector<8x4xf32>
    %196 = vector.extract_strided_slice %189 {offsets = [0, 0], sizes = [8, 1], strides = [1, 1]} : vector<8x4xf32> to vector<8x1xf32>
    %197 = vector.extract_strided_slice %2 {offsets = [0, 0], sizes = [8, 32], strides = [1, 1]} : vector<8x128xf32> to vector<8x32xf32>
    %198 = vector.broadcast %196 : vector<8x1xf32> to vector<8x32xf32>
    %199 = arith.mulf %198, %197 : vector<8x32xf32>
    %200 = vector.extract_strided_slice %189 {offsets = [0, 1], sizes = [8, 1], strides = [1, 1]} : vector<8x4xf32> to vector<8x1xf32>
    %201 = vector.extract_strided_slice %2 {offsets = [0, 32], sizes = [8, 32], strides = [1, 1]} : vector<8x128xf32> to vector<8x32xf32>
    %202 = vector.broadcast %200 : vector<8x1xf32> to vector<8x32xf32>
    %203 = arith.mulf %202, %201 : vector<8x32xf32>
    %204 = arith.addf %199, %203 : vector<8x32xf32>
    %205 = vector.extract_strided_slice %189 {offsets = [0, 2], sizes = [8, 1], strides = [1, 1]} : vector<8x4xf32> to vector<8x1xf32>
    %206 = vector.extract_strided_slice %2 {offsets = [0, 64], sizes = [8, 32], strides = [1, 1]} : vector<8x128xf32> to vector<8x32xf32>
    %207 = vector.broadcast %205 : vector<8x1xf32> to vector<8x32xf32>
    %208 = arith.mulf %207, %206 : vector<8x32xf32>
    %209 = arith.addf %204, %208 : vector<8x32xf32>
    %210 = vector.extract_strided_slice %189 {offsets = [0, 3], sizes = [8, 1], strides = [1, 1]} : vector<8x4xf32> to vector<8x1xf32>
    %211 = vector.extract_strided_slice %2 {offsets = [0, 96], sizes = [8, 32], strides = [1, 1]} : vector<8x128xf32> to vector<8x32xf32>
    %212 = vector.broadcast %210 : vector<8x1xf32> to vector<8x32xf32>
    %213 = arith.mulf %212, %211 : vector<8x32xf32>
    %214 = arith.addf %209, %213 : vector<8x32xf32>
    %215 = arith.addf %214, %8 : vector<8x32xf32>
    %216 = arith.mulf %181, %191 : vector<8x20xf32>
    %c0_85 = arith.constant 0 : index
    %c0_86 = arith.constant 0 : index
    %217 = vector.load %arg4[%c0_85, %c0_86] : memref<20x32xf32, #tpu.memory_space<vmem>>, vector<20x32xf32>
    %cst_87 = arith.constant dense<0.000000e+00> : vector<8x32xf32>
    %218 = tpu.matmul %216, %217, %cst_87 {dimension_numbers = #tpu.dot_dimension_numbers<[1], [0], [0], [1], [0, 0, 1, 1], [], []>} : vector<8x20xf32>, vector<20x32xf32>, vector<8x32xf32> -> vector<8x32xf32>
    %219 = arith.addf %215, %218 : vector<8x32xf32>
    %220 = math.tanh %219 : vector<8x32xf32>
    %c0_88 = arith.constant 0 : index
    %c0_89 = arith.constant 0 : index
    %221 = vector.load %arg7[%c0_88, %c0_89] : memref<32x20xf32, #tpu.memory_space<vmem>>, vector<32x20xf32>
    %cst_90 = arith.constant dense<0.000000e+00> : vector<8x20xf32>
    %222 = tpu.matmul %220, %221, %cst_90 {dimension_numbers = #tpu.dot_dimension_numbers<[1], [0], [0], [1], [0, 0, 1, 1], [], []>} : vector<8x32xf32>, vector<32x20xf32>, vector<8x20xf32> -> vector<8x20xf32>
    %223 = arith.addf %12, %222 : vector<8x20xf32>
    %cst_91 = arith.constant 0.000000e+00 : f32
    %224 = vector.broadcast %cst_91 : f32 to vector<8x20xf32>
    %225 = arith.cmpf ogt, %193, %224 : vector<8x20xf32>
    %cst_92 = arith.constant -1.000000e+10 : f32
    %226 = vector.broadcast %cst_92 : f32 to vector<8x20xf32>
    %227 = arith.select %15, %223, %226 : vector<8x20xi1>, vector<8x20xf32>
    %cst_93 = arith.constant -3.40282347E+38 : f32
    %228 = vector.broadcast %cst_93 : f32 to vector<8x20xf32>
    %229 = arith.select %225, %227, %228 : vector<8x20xi1>, vector<8x20xf32>
    %cst_94 = arith.constant dense<0xFF800000> : vector<8xf32>
    %230 = vector.multi_reduction <maximumf>, %229, %cst_94 [1] : vector<8x20xf32> to vector<8xf32>
    %231 = vector.shape_cast %230 : vector<8xf32> to vector<8x1xf32>
    %232 = vector.broadcast %231 : vector<8x1xf32> to vector<8x20xf32>
    %233 = arith.cmpf oeq, %229, %232 : vector<8x20xf32>
    %c20_i32_95 = arith.constant 20 : i32
    %234 = vector.broadcast %c20_i32_95 : i32 to vector<8x20xi32>
    %235 = arith.select %233, %16, %234 : vector<8x20xi1>, vector<8x20xi32>
    %cst_96 = arith.constant dense<2147483647> : vector<8xi32>
    %236 = vector.multi_reduction <minsi>, %235, %cst_96 [1] : vector<8x20xi32> to vector<8xi32>
    %237 = vector.shape_cast %236 : vector<8xi32> to vector<8x1xi32>
    %238 = vector.broadcast %231 : vector<8x1xf32> to vector<8x20xf32>
    %239 = arith.subf %229, %238 : vector<8x20xf32>
    %240 = math.exp %239 : vector<8x20xf32>
    %cst_97 = arith.constant dense<0.000000e+00> : vector<8xf32>
    %241 = vector.multi_reduction <add>, %240, %cst_97 [1] : vector<8x20xf32> to vector<8xf32>
    %242 = vector.shape_cast %241 : vector<8xf32> to vector<8x1xf32>
    %243 = math.log %242 : vector<8x1xf32>
    %244 = arith.addf %231, %243 : vector<8x1xf32>
    %245 = arith.subf %231, %244 : vector<8x1xf32>
    %cst_98 = arith.constant 0.000000e+00 : f32
    %246 = vector.broadcast %cst_98 : f32 to vector<8x1xf32>
    %247 = vector.extract_strided_slice %195 {offsets = [0, 1], sizes = [8, 1], strides = [1, 1]} : vector<8x4xf32> to vector<8x1xf32>
    %cst_99 = arith.constant 5.000000e+00 : f32
    %248 = vector.broadcast %cst_99 : f32 to vector<8x1xf32>
    %249 = arith.mulf %247, %248 : vector<8x1xf32>
    %250 = arith.addf %246, %249 : vector<8x1xf32>
    %251 = vector.extract_strided_slice %195 {offsets = [0, 2], sizes = [8, 1], strides = [1, 1]} : vector<8x4xf32> to vector<8x1xf32>
    %cst_100 = arith.constant 1.000000e+01 : f32
    %252 = vector.broadcast %cst_100 : f32 to vector<8x1xf32>
    %253 = arith.mulf %251, %252 : vector<8x1xf32>
    %254 = arith.addf %250, %253 : vector<8x1xf32>
    %255 = vector.extract_strided_slice %195 {offsets = [0, 3], sizes = [8, 1], strides = [1, 1]} : vector<8x4xf32> to vector<8x1xf32>
    %cst_101 = arith.constant 1.500000e+01 : f32
    %256 = vector.broadcast %cst_101 : f32 to vector<8x1xf32>
    %257 = arith.mulf %255, %256 : vector<8x1xf32>
    %258 = arith.addf %254, %257 : vector<8x1xf32>
    %259 = arith.sitofp %237 : vector<8x1xi32> to vector<8x1xf32>
    %260 = arith.subf %259, %258 : vector<8x1xf32>
    %261 = vector.broadcast %237 : vector<8x1xi32> to vector<8x20xi32>
    %262 = arith.cmpi eq, %16, %261 : vector<8x20xi32>
    %263 = arith.extui %262 : vector<8x20xi1> to vector<8x20xi32>
    %264 = arith.sitofp %263 : vector<8x20xi32> to vector<8x20xf32>
    %265 = arith.addf %181, %264 : vector<8x20xf32>
    %266 = vector.broadcast %260 : vector<8x1xf32> to vector<8x4xf32>
    %267 = arith.mulf %195, %266 : vector<8x4xf32>
    %268 = arith.addf %184, %267 : vector<8x4xf32>
    %269 = vector.broadcast %245 : vector<8x1xf32> to vector<8x4xf32>
    %270 = arith.mulf %195, %269 : vector<8x4xf32>
    %271 = arith.addf %187, %270 : vector<8x4xf32>
    %c3 = arith.constant 3 : index
    %c0_102 = arith.constant 0 : index
    %c0_103 = arith.constant 0 : index
    %272 = vector.load %arg9[%c3, %c0_102, %c0_103] : memref<4x8x4xf32, #tpu.memory_space<vmem>>, vector<1x8x4xf32>
    %273 = vector.shape_cast %272 : vector<1x8x4xf32> to vector<8x4xf32>
    %c3_104 = arith.constant 3 : index
    %c0_105 = arith.constant 0 : index
    %c0_106 = arith.constant 0 : index
    %274 = vector.load %arg10[%c3_104, %c0_105, %c0_106] : memref<4x8x20xf32, #tpu.memory_space<vmem>>, vector<1x8x20xf32>
    %275 = vector.shape_cast %274 : vector<1x8x20xf32> to vector<8x20xf32>
    %c3_107 = arith.constant 3 : index
    %c0_108 = arith.constant 0 : index
    %c0_109 = arith.constant 0 : index
    %276 = vector.load %arg11[%c3_107, %c0_108, %c0_109] : memref<4x8x20xf32, #tpu.memory_space<vmem>>, vector<1x8x20xf32>
    %277 = vector.shape_cast %276 : vector<1x8x20xf32> to vector<8x20xf32>
    %c3_110 = arith.constant 3 : index
    %c0_111 = arith.constant 0 : index
    %c0_112 = arith.constant 0 : index
    %278 = vector.load %arg12[%c3_110, %c0_111, %c0_112] : memref<4x8x4xf32, #tpu.memory_space<vmem>>, vector<1x8x4xf32>
    %279 = vector.shape_cast %278 : vector<1x8x4xf32> to vector<8x4xf32>
    %280 = vector.extract_strided_slice %273 {offsets = [0, 0], sizes = [8, 1], strides = [1, 1]} : vector<8x4xf32> to vector<8x1xf32>
    %281 = vector.extract_strided_slice %2 {offsets = [0, 0], sizes = [8, 32], strides = [1, 1]} : vector<8x128xf32> to vector<8x32xf32>
    %282 = vector.broadcast %280 : vector<8x1xf32> to vector<8x32xf32>
    %283 = arith.mulf %282, %281 : vector<8x32xf32>
    %284 = vector.extract_strided_slice %273 {offsets = [0, 1], sizes = [8, 1], strides = [1, 1]} : vector<8x4xf32> to vector<8x1xf32>
    %285 = vector.extract_strided_slice %2 {offsets = [0, 32], sizes = [8, 32], strides = [1, 1]} : vector<8x128xf32> to vector<8x32xf32>
    %286 = vector.broadcast %284 : vector<8x1xf32> to vector<8x32xf32>
    %287 = arith.mulf %286, %285 : vector<8x32xf32>
    %288 = arith.addf %283, %287 : vector<8x32xf32>
    %289 = vector.extract_strided_slice %273 {offsets = [0, 2], sizes = [8, 1], strides = [1, 1]} : vector<8x4xf32> to vector<8x1xf32>
    %290 = vector.extract_strided_slice %2 {offsets = [0, 64], sizes = [8, 32], strides = [1, 1]} : vector<8x128xf32> to vector<8x32xf32>
    %291 = vector.broadcast %289 : vector<8x1xf32> to vector<8x32xf32>
    %292 = arith.mulf %291, %290 : vector<8x32xf32>
    %293 = arith.addf %288, %292 : vector<8x32xf32>
    %294 = vector.extract_strided_slice %273 {offsets = [0, 3], sizes = [8, 1], strides = [1, 1]} : vector<8x4xf32> to vector<8x1xf32>
    %295 = vector.extract_strided_slice %2 {offsets = [0, 96], sizes = [8, 32], strides = [1, 1]} : vector<8x128xf32> to vector<8x32xf32>
    %296 = vector.broadcast %294 : vector<8x1xf32> to vector<8x32xf32>
    %297 = arith.mulf %296, %295 : vector<8x32xf32>
    %298 = arith.addf %293, %297 : vector<8x32xf32>
    %299 = arith.addf %298, %8 : vector<8x32xf32>
    %300 = arith.mulf %265, %275 : vector<8x20xf32>
    %c0_113 = arith.constant 0 : index
    %c0_114 = arith.constant 0 : index
    %301 = vector.load %arg4[%c0_113, %c0_114] : memref<20x32xf32, #tpu.memory_space<vmem>>, vector<20x32xf32>
    %cst_115 = arith.constant dense<0.000000e+00> : vector<8x32xf32>
    %302 = tpu.matmul %300, %301, %cst_115 {dimension_numbers = #tpu.dot_dimension_numbers<[1], [0], [0], [1], [0, 0, 1, 1], [], []>} : vector<8x20xf32>, vector<20x32xf32>, vector<8x32xf32> -> vector<8x32xf32>
    %303 = arith.addf %299, %302 : vector<8x32xf32>
    %304 = math.tanh %303 : vector<8x32xf32>
    %c0_116 = arith.constant 0 : index
    %c0_117 = arith.constant 0 : index
    %305 = vector.load %arg7[%c0_116, %c0_117] : memref<32x20xf32, #tpu.memory_space<vmem>>, vector<32x20xf32>
    %cst_118 = arith.constant dense<0.000000e+00> : vector<8x20xf32>
    %306 = tpu.matmul %304, %305, %cst_118 {dimension_numbers = #tpu.dot_dimension_numbers<[1], [0], [0], [1], [0, 0, 1, 1], [], []>} : vector<8x32xf32>, vector<32x20xf32>, vector<8x20xf32> -> vector<8x20xf32>
    %307 = arith.addf %12, %306 : vector<8x20xf32>
    %cst_119 = arith.constant 0.000000e+00 : f32
    %308 = vector.broadcast %cst_119 : f32 to vector<8x20xf32>
    %309 = arith.cmpf ogt, %277, %308 : vector<8x20xf32>
    %cst_120 = arith.constant -1.000000e+10 : f32
    %310 = vector.broadcast %cst_120 : f32 to vector<8x20xf32>
    %311 = arith.select %15, %307, %310 : vector<8x20xi1>, vector<8x20xf32>
    %cst_121 = arith.constant -3.40282347E+38 : f32
    %312 = vector.broadcast %cst_121 : f32 to vector<8x20xf32>
    %313 = arith.select %309, %311, %312 : vector<8x20xi1>, vector<8x20xf32>
    %cst_122 = arith.constant dense<0xFF800000> : vector<8xf32>
    %314 = vector.multi_reduction <maximumf>, %313, %cst_122 [1] : vector<8x20xf32> to vector<8xf32>
    %315 = vector.shape_cast %314 : vector<8xf32> to vector<8x1xf32>
    %316 = vector.broadcast %315 : vector<8x1xf32> to vector<8x20xf32>
    %317 = arith.cmpf oeq, %313, %316 : vector<8x20xf32>
    %c20_i32_123 = arith.constant 20 : i32
    %318 = vector.broadcast %c20_i32_123 : i32 to vector<8x20xi32>
    %319 = arith.select %317, %16, %318 : vector<8x20xi1>, vector<8x20xi32>
    %cst_124 = arith.constant dense<2147483647> : vector<8xi32>
    %320 = vector.multi_reduction <minsi>, %319, %cst_124 [1] : vector<8x20xi32> to vector<8xi32>
    %321 = vector.shape_cast %320 : vector<8xi32> to vector<8x1xi32>
    %322 = vector.broadcast %315 : vector<8x1xf32> to vector<8x20xf32>
    %323 = arith.subf %313, %322 : vector<8x20xf32>
    %324 = math.exp %323 : vector<8x20xf32>
    %cst_125 = arith.constant dense<0.000000e+00> : vector<8xf32>
    %325 = vector.multi_reduction <add>, %324, %cst_125 [1] : vector<8x20xf32> to vector<8xf32>
    %326 = vector.shape_cast %325 : vector<8xf32> to vector<8x1xf32>
    %327 = math.log %326 : vector<8x1xf32>
    %328 = arith.addf %315, %327 : vector<8x1xf32>
    %329 = arith.subf %315, %328 : vector<8x1xf32>
    %cst_126 = arith.constant 0.000000e+00 : f32
    %330 = vector.broadcast %cst_126 : f32 to vector<8x1xf32>
    %331 = vector.extract_strided_slice %279 {offsets = [0, 1], sizes = [8, 1], strides = [1, 1]} : vector<8x4xf32> to vector<8x1xf32>
    %cst_127 = arith.constant 5.000000e+00 : f32
    %332 = vector.broadcast %cst_127 : f32 to vector<8x1xf32>
    %333 = arith.mulf %331, %332 : vector<8x1xf32>
    %334 = arith.addf %330, %333 : vector<8x1xf32>
    %335 = vector.extract_strided_slice %279 {offsets = [0, 2], sizes = [8, 1], strides = [1, 1]} : vector<8x4xf32> to vector<8x1xf32>
    %cst_128 = arith.constant 1.000000e+01 : f32
    %336 = vector.broadcast %cst_128 : f32 to vector<8x1xf32>
    %337 = arith.mulf %335, %336 : vector<8x1xf32>
    %338 = arith.addf %334, %337 : vector<8x1xf32>
    %339 = vector.extract_strided_slice %279 {offsets = [0, 3], sizes = [8, 1], strides = [1, 1]} : vector<8x4xf32> to vector<8x1xf32>
    %cst_129 = arith.constant 1.500000e+01 : f32
    %340 = vector.broadcast %cst_129 : f32 to vector<8x1xf32>
    %341 = arith.mulf %339, %340 : vector<8x1xf32>
    %342 = arith.addf %338, %341 : vector<8x1xf32>
    %343 = arith.sitofp %321 : vector<8x1xi32> to vector<8x1xf32>
    %344 = arith.subf %343, %342 : vector<8x1xf32>
    %345 = vector.broadcast %321 : vector<8x1xi32> to vector<8x20xi32>
    %346 = arith.cmpi eq, %16, %345 : vector<8x20xi32>
    %347 = arith.extui %346 : vector<8x20xi1> to vector<8x20xi32>
    %348 = arith.sitofp %347 : vector<8x20xi32> to vector<8x20xf32>
    %349 = arith.addf %265, %348 : vector<8x20xf32>
    %350 = vector.broadcast %344 : vector<8x1xf32> to vector<8x4xf32>
    %351 = arith.mulf %279, %350 : vector<8x4xf32>
    %352 = arith.addf %268, %351 : vector<8x4xf32>
    %353 = vector.broadcast %329 : vector<8x1xf32> to vector<8x4xf32>
    %354 = arith.mulf %279, %353 : vector<8x4xf32>
    %355 = arith.addf %271, %354 : vector<8x4xf32>
    %cst_130 = arith.constant 0.000000e+00 : f32
    %356 = vector.broadcast %cst_130 : f32 to vector<8x128xf32>
    %c0_131 = arith.constant 0 : index
    %c0_132 = arith.constant 0 : index
    %357 = vector.load %arg13[%c0_131, %c0_132] : memref<8x128xf32, #tpu.memory_space<vmem>>, vector<8x128xf32>
    tpu.vector_store %arg13[%c0_131, %c0_132], %356 {strides = array<i32>} : memref<8x128xf32, #tpu.memory_space<vmem>>, vector<8x128xf32>,
    %c0_133 = arith.constant 0 : index
    %c0_134 = arith.constant 0 : index
    %358 = vector.load %arg13[%c0_133, %c0_134] : memref<8x128xf32, #tpu.memory_space<vmem>>, vector<8x4xf32>
    tpu.vector_store %arg13[%c0_133, %c0_134], %352 {strides = array<i32>} : memref<8x128xf32, #tpu.memory_space<vmem>>, vector<8x4xf32>,
    %c0_135 = arith.constant 0 : index
    %c4 = arith.constant 4 : index
    %359 = vector.load %arg13[%c0_135, %c4] : memref<8x128xf32, #tpu.memory_space<vmem>>, vector<8x4xf32>
    tpu.vector_store %arg13[%c0_135, %c4], %355 {strides = array<i32>} : memref<8x128xf32, #tpu.memory_space<vmem>>, vector<8x4xf32>,
    %c0_136 = arith.constant 0 : index
    %c8 = arith.constant 8 : index
    %360 = vector.load %arg13[%c0_136, %c8] : memref<8x128xf32, #tpu.memory_space<vmem>>, vector<8x20xf32>
    tpu.vector_store %arg13[%c0_136, %c8], %349 {strides = array<i32>} : memref<8x128xf32, #tpu.memory_space<vmem>>, vector<8x20xf32>,
    return
  }
}

</mosaic_0001>

<bundles_post_ra>
// kernel: tile.9
= control target key start
LH: loop header
LB: loop body
LE: loop exit
PB: predicated region body
PF: predicated region fallthrough
CT: control target
= control target key end

     0   :  { %vm43_vm0 = vcmask 1047556   ;;  %vm45_vm1 = vcmask 39936   ;;  %s94_s22 = smov 5   ;;  %s95_s25 = smov 10   ;;  %vm55_vm2 = vcmask 162936   ;;  %vm65_vm3 = vcmask 121936   ;;  %s147_s0 = inlined_call_operand.vmem [shape: f32[8,4,5], index: 0, kind: input, shape index: {}]   ;;  %s148_s1 = inlined_call_operand.vmem [shape: f32[8,20], index: 1, kind: output, shape index: {}]  }
   0x1   :  { %v83_v0 = vld [vmem:[%s147_s0 + $0x1c] sm:$0xf]  ;;  %v84_v1 = vld [vmem:[%s147_s0 + $0x18] sm:$0xf]  ;;  %v85_v2 = vld [vmem:[%s147_s0 + $0x14] sm:$0xf] }
   0x2   :  { %9 = vst [vmem:[#allocation0 + $0x38] sm:$0xf] %v83_v0  ;;  %14 = vst [vmem:[#allocation0 + $0x30] sm:$0xf] %v84_v1  ;;  %v86_v3 = vld [vmem:[%s147_s0 + $0x10] sm:$0xf] }
   0x3   :  { %19 = vst [vmem:[#allocation0 + $0x28] sm:$0xf] %v85_v2  ;;  %v87_v4 = vld [vmem:[%s147_s0 + $0xc] sm:$0xf]  ;;  %v88_v5 = vld [vmem:[%s147_s0 + $0x8] sm:$0xf] }
   0x4   :  { %24 = vst [vmem:[#allocation0 + $0x20] sm:$0xf] %v86_v3  ;;  %29 = vst [vmem:[#allocation0 + $0x18] sm:$0xf] %v87_v4  ;;  %v89_v6 = vld [vmem:[%s147_s0 + $0x4] sm:$0xf] }
   0x5   :  { %34 = vst [vmem:[#allocation0 + $0x10] sm:$0xf] %v88_v5  ;;  %v39_v7 = vld [vmem:[%s147_s0] sm:$0xf]  ;;  %38 = vst [vmem:[#allocation0 + $0x8] sm:$0xf] %v89_v6 }
   0x6   :  { %40 = vst [vmem:[#allocation0] sm:$0xf] %v39_v7  ;;  %s93_s0 = smov 15   ;;  %vm75_vm4 = vcmask 80936  }
   0xb   :  { %v50_v8 = vld [vmem:[#allocation0 + $0x3] ss:$8 sm:$0xf0]   ;;  %v60_v9 = vld [vmem:[#allocation0 + $0x2] ss:$8 sm:$0xf0]  }
   0xc   :  { %v70_v14 = vld [vmem:[#allocation0 + $0x1] ss:$8 sm:$0xf0]   ;;  %v42_v17 = vld [vmem:[#allocation0] ss:$8 sm:$0xf0]  }
   0xd   :  { %v48_v10 = vld [vmem:[#allocation0 + $0x3] ss:$8 sm:$0xf]   ;;  %v58_v11 = vld [vmem:[#allocation0 + $0x2] ss:$8 sm:$0xf]  }
   0xe   :  { %v52_v12 = vsel %vm43_vm0, %v50_v8, %v48_v10  ;;  %v68_v13 = vld [vmem:[#allocation0 + $0x1] ss:$8 sm:$0xf]   ;;  %v41_v16 = vld [vmem:[#allocation0] ss:$8 sm:$0xf]   ;;  %v62_v18 = vsel %vm43_vm0, %v60_v9, %v58_v11 }
   0xf   :  { %53 = vrot.lane.b32.xlu0 %v52_v12, %s93_s0  ;;  %v72_v15 = vsel %vm43_vm0, %v70_v14, %v68_v13  ;;  %v44_v19 = vsel %vm43_vm0, %v42_v17, %v41_v16 }
  0x10   :  { %73 = vrot.lane.b32.xlu1 %v72_v15, %s94_s22  ;;  %46 = vst.msk [vmem:[%s148_s1] sm:$0xff] %vm45_vm1, %v44_v19  }
  0x13   :  { %63 = vrot.lane.b32.xlu0 %v62_v18, %s95_s25 }
  0x81   :  { %v54_v20 = vpop.permute.xlu0 %53  }
  0x82   :  { %56 = vst.msk [vmem:[%s148_s1] sm:$0xff] %vm55_vm2, %v54_v20   ;;  %v74_v21 = vpop.permute.xlu1 %73  }
  0x85   :  { %v64_v22 = vpop.permute.xlu0 %63  }
  0x86   :  { %66 = vst.msk [vmem:[%s148_s1] sm:$0xff] %vm65_vm3, %v64_v22  }
  0x87   :  { %76 = vst.msk [vmem:[%s148_s1] sm:$0xff] %vm75_vm4, %v74_v21  }

// kernel: act_layer_forward.1
= control target key start
LH: loop header
LB: loop body
LE: loop exit
PB: predicated region body
PF: predicated region fallthrough
CT: control target
= control target key end

     0   :  { %v1549_v0 = vmov 0.0   ;;  %vm1550_vm0 = vmmov 0   ;;  %v1551_v3 = vmov 3   ;;  %v1552_v6 = vmov 1   ;;  %s1555_s16 = smov 64   ;;  %s1556_s17 = smov 96   ;;  %s2098_s3 = inlined_call_operand.vmem [shape: f32[24,128], index: 3, kind: input, shape index: {}]   ;;  %s2099_s9 = inlined_call_operand.vmem [shape: f32[4,8,4], index: 9, kind: input, shape index: {}]   ;;  %s2100_s0 = inlined_call_operand.vmem [shape: f32[8,24], index: 0, kind: input, shape index: {}]   ;;  %s2101_s4 = inlined_call_operand.vmem [shape: f32[20,32], index: 4, kind: input, shape index: {}]   ;;  %s2102_s10 = inlined_call_operand.vmem [shape: f32[4,8,20], index: 10, kind: input, shape index: {}]   ;;  %s2103_s6 = inlined_call_operand.vmem [shape: f32[128,20], index: 6, kind: input, shape index: {}]   ;;  %s2104_s7 = inlined_call_operand.vmem [shape: f32[32,20], index: 7, kind: input, shape index: {}]   ;;  %s2105_s1 = inlined_call_operand.vmem [shape: f32[8,128], index: 1, kind: input, shape index: {}]   ;;  %s2106_s5 = inlined_call_operand.vmem [shape: f32[1,32], index: 5, kind: input, shape index: {}]   ;;  %s2107_s8 = inlined_call_operand.vmem [shape: f32[1,20], index: 8, kind: input, shape index: {}]   ;;  %s2108_s2 = inlined_call_operand.vmem [shape: f32[8,20], index: 2, kind: input, shape index: {}]   ;;  %s2109_s11 = inlined_call_operand.vmem [shape: f32[4,8,20], index: 11, kind: input, shape index: {}]   ;;  %s2110_s12 = inlined_call_operand.vmem [shape: f32[4,8,4], index: 12, kind: input, shape index: {}]   ;;  %s2111_s13 = inlined_call_operand.vmem [shape: f32[8,128], index: 13, kind: output, shape index: {}]  }
   0x1   :  { %1371 = vmatprep.subr.mxu0 %v1549_v0  ;;  %v47_v1 = vld [vmem:[%s2098_s3 + $0x10] sm:$0xff]  ;;  %v46_v2 = vld [vmem:[%s2098_s3 + $0x8] sm:$0xff]  ;;  %1377 = vmatprep.mubr.msk.f32.mxu0 %vm1550_vm0, %v1549_v0  ;;  %v227_v4 = vld [vmem:[%s2099_s9] sm:$0xff]  ;;  %vm48_vm1 = vcmask 195584   ;;  %vm276_vm2 = vcmask 1043456   ;;  %v1553_v10 = vmov 0   ;;  %1264 = vst [vmem:[%s2111_s13] sm:$0xff] %v1549_v0 }
   0x2   :  { %1372 = vmatpush3.msra.mxu0 %v47_v1  ;;  %1510 = vset.pattern.permute.xlu1 %v1551_v3  ;;  %v45_v5 = vld [vmem:[%s2098_s3] sm:$0xff]  ;;  %v1657_v8 = vld [vmem:[%s2101_s4 + $0x10] sm:$0xf]  ;;  %v1670_v11 = vld [vmem:[%s2101_s4 + $0x8] sm:$0xff]  ;;  %v1554_v12 = vmov 2   ;;  %vm272_vm3 = vcmask 162816  }
   0x3   :  { %1373 = vmatprep.subr.mxu0 %v1549_v0  ;;  %1508 = vset.pattern.permute.xlu0 %v1552_v6  ;;  %v44_v7 = vld [vmem:[%s2100_s0] sm:$0xff]  ;;  %v138_v15 = vld [vmem:[%s2103_s6 + $0x78] sm:$0xff]  ;;  %v137_v16 = vld [vmem:[%s2103_s6 + $0x70] sm:$0xff]  ;;  %s1557_s22 = smov 32   ;;  %vm356_vm4 = vcmask 261120  }
   0x4   :  { %1374 = vmatpush3.msra.mxu0 %v46_v2  ;;  %258 = vperm.xlu1 %1510, %v227_v4   ;;  %v228_v9 = vld [vmem:[%s2102_s10] sm:$0xff]  ;;  %v136_v17 = vld [vmem:[%s2103_s6 + $0x68] sm:$0xff]  ;;  %v134_v19 = vld [vmem:[%s2103_s6 + $0x58] sm:$0xff] }
   0x5   :  { %1375 = vmatprep.subr.mxu0 %v1549_v0  ;;  %238 = vperm.xlu0 %1508, %v227_v4   ;;  %v1677_v13 = vld [vmem:[%s2101_s4] sm:$0xff]  ;;  %v268_v14 = vmul.f32 0.0, %v228_v9  ;;  %v133_v20 = vld [vmem:[%s2103_s6 + $0x50] sm:$0xff]  ;;  %v132_v21 = vld [vmem:[%s2103_s6 + $0x48] sm:$0xff] }
   0x6   :  { %1376 = vmatpush3.msra.mxu0 %v45_v5  ;;  %1380 = vmatprep.subr.mxu1 %v1549_v0  ;;  %v135_v18 = vld [vmem:[%s2103_s6 + $0x60] sm:$0xff]  ;;  %v130_v24 = vld [vmem:[%s2103_s6 + $0x38] sm:$0xff]  ;;  %v129_v25 = vld [vmem:[%s2103_s6 + $0x30] sm:$0xff] }
   0x7   :  { %1378 = vmatmul.mubr.msk.f32.vlgmr.msra.gmra.mxu0 %vm48_vm1, %v44_v7  ;;  %1415 = vmatprep.subr.mxu0 %v1549_v0  ;;  %v131_v22 = vld [vmem:[%s2103_s6 + $0x40] sm:$0xff]  ;;  %v128_v27 = vld [vmem:[%s2103_s6 + $0x28] sm:$0xff]  ;;  %v126_v32 = vld [vmem:[%s2103_s6 + $0x18] sm:$0xff] }
   0x8   :  { %1511 = vset.pattern.permute.xlu1 %v1553_v10  ;;  %1416 = vmatpush3.msk.msra.mxu0 %vm276_vm2, %v1657_v8  ;;  %v127_v29 = vld [vmem:[%s2103_s6 + $0x20] sm:$0xff]  ;;  %v1749_v33 = vld [vmem:[%s2104_s7 + $0x18] sm:$0xff]  ;;  %v1756_v35 = vld [vmem:[%s2104_s7 + $0x10] sm:$0xff] }
   0x9   :  { %1509 = vset.pattern.permute.xlu0 %v1554_v12  ;;  %233 = vperm.xlu1 %1511, %v227_v4   ;;  %v125_v36 = vld [vmem:[%s2103_s6 + $0x10] sm:$0xff]  ;;  %v124_v39 = vld [vmem:[%s2103_s6 + $0x8] sm:$0xff]  ;;  %v123_v42 = vld [vmem:[%s2103_s6] sm:$0xff] }
   0xa   :  { %248 = vperm.xlu0 %1509, %v227_v4   ;;  %1417 = vmatprep.subr.mxu0 %v1549_v0  ;;  %v1773_v40 = vld [vmem:[%s2104_s7 + $0x8] sm:$0xff]  ;;  %v1784_v43 = vld [vmem:[%s2104_s7] sm:$0xff] }
   0xb   :  { %1418 = vmatpush3.msra.mxu0 %v1670_v11  ;;  %1421 = vmatprep.mubr.msk.f32.mxu0 %vm1550_vm0, %v1549_v0  ;;  %v122_v44 = vld [vmem:[%s2105_s1] sm:$0xff] }
   0xc   :  { %1419 = vmatprep.subr.mxu0 %v1549_v0  ;;  %1412 = vmatprep.mubr.msk.f32.mxu1 %vm1550_vm0, %v1549_v0  ;;  %v1808_v53 = vld [vmem:[%s2106_s5] ss:$0 sm:$0xff]  ;;  %s1559_s5 = smov 126  }
   0xd   :  { %1420 = vmatpush3.msra.mxu0 %v1677_v13  ;;  %1513 = vset.pattern.permute.xlu1 %v1554_v12  ;;  %v1285_v60 = vld [vmem:[%s2107_s8] ss:$0 sm:$0xff]  ;;  %s1561_s8 = smov 8  }
   0xe   :  { %1422 = vmatmul.mubr.msk.f32.vlgmr.msra.gmra.mxu0 %vm272_vm3, %v268_v14  ;;  %1424 = vmatprep.subr.mxu0 %v1549_v0  ;;  %v1829_v62 = vld [vmem:[%s2108_s2] sm:$0xff]  ;;  %v225_v14 = vlaneseq }
   0xf   :  { %1432 = vmatprep.mubr.msk.f32.mxu0 %vm1550_vm0, %v1549_v0  ;;  %1512 = vset.pattern.permute.xlu0 %v1552_v6  ;;  %v229_v63 = vld [vmem:[%s2109_s11] sm:$0xff]  ;;  %vm224_vm5 = vcmp.gt.f32.partialorder %v1829_v62, 0.0 }
  0x10   :  { %1381 = vmatpush3.msra.mxu1 %v138_v15  ;;  %1425 = vmatpush3.msra.mxu0 %v1749_v33  ;;  %vm431_vm6 = vcmp.gt.f32.partialorder %v229_v63, 0.0  ;;  %v1842_v15 = vand.u32 127, %v225_v14 }
  0x11   :  { %1382 = vmatprep.subr.mxu1 %v1549_v0  ;;  %1426 = vmatprep.subr.mxu0 %v1549_v0 }
  0x12   :  { %1383 = vmatpush3.msra.mxu1 %v137_v16  ;;  %1427 = vmatpush3.msra.mxu0 %v1756_v35 }
  0x13   :  { %1384 = vmatprep.subr.mxu1 %v1549_v0  ;;  %1428 = vmatprep.subr.mxu0 %v1549_v0 }
  0x14   :  { %1385 = vmatpush3.msra.mxu1 %v136_v17  ;;  %1429 = vmatpush3.msra.mxu0 %v1773_v40 }
  0x15   :  { %1386 = vmatprep.subr.mxu1 %v1549_v0  ;;  %1430 = vmatprep.subr.mxu0 %v1549_v0 }
  0x16   :  { %1387 = vmatpush3.msra.mxu1 %v135_v18  ;;  %1431 = vmatpush3.msra.mxu0 %v1784_v43 }
  0x17   :  { %1388 = vmatprep.subr.mxu1 %v1549_v0  ;;  %1435 = vmatprep.subr.mxu0 %v1549_v0 }
  0x18   :  { %1389 = vmatpush3.msra.mxu1 %v134_v19 }
  0x19   :  { %1390 = vmatprep.subr.mxu1 %v1549_v0 }
  0x1a   :  { %1391 = vmatpush3.msra.mxu1 %v133_v20 }
  0x1b   :  { %1392 = vmatprep.subr.mxu1 %v1549_v0 }
  0x1c   :  { %1393 = vmatpush3.msra.mxu1 %v132_v21  ;;  %v1290_v21 = vld [vmem:[%s2099_s9 + $0x8] sm:$0xff] }
  0x1d   :  { %1394 = vmatprep.subr.mxu1 %v1549_v0 }
  0x1e   :  { %1395 = vmatpush3.msra.mxu1 %v131_v22 }
  0x1f   :  { %1396 = vmatprep.subr.mxu1 %v1549_v0 }
  0x20   :  { %1397 = vmatpush3.msra.mxu1 %v130_v24 }
  0x21   :  { %1398 = vmatprep.subr.mxu1 %v1549_v0 }
  0x22   :  { %1399 = vmatpush3.msra.mxu1 %v129_v25 }
  0x23   :  { %1400 = vmatprep.subr.mxu1 %v1549_v0 }
  0x24   :  { %1401 = vmatpush3.msra.mxu1 %v128_v27 }
  0x25   :  { %1402 = vmatprep.subr.mxu1 %v1549_v0 }
  0x26   :  { %1403 = vmatpush3.msra.mxu1 %v127_v29 }
  0x27   :  { %1404 = vmatprep.subr.mxu1 %v1549_v0 }
  0x28   :  { %1405 = vmatpush3.msra.mxu1 %v126_v32  ;;  %v1291_v32 = vld [vmem:[%s2102_s10 + $0x8] sm:$0xff] }
  0x29   :  { %1406 = vmatprep.subr.mxu1 %v1549_v0 }
  0x2a   :  { %1407 = vmatpush3.msra.mxu1 %v125_v36 }
  0x2b   :  { %1408 = vmatprep.subr.mxu1 %v1549_v0 }
  0x2c   :  { %1409 = vmatpush3.msra.mxu1 %v124_v39 }
  0x2d   :  { %1410 = vmatprep.subr.mxu1 %v1549_v0 }
  0x2e   :  { %1411 = vmatpush3.msra.mxu1 %v123_v42 }
  0x2f   :  { %1413 = vmatmul.mubr.f32.vlgmr.msra.gmra.mxu1 %v122_v44  ;;  %1455 = vmatprep.subr.mxu1 %v1549_v0 }
  0x30   :  { %1461 = vmatprep.mubr.msk.f32.mxu1 %vm1550_vm0, %v1549_v0  ;;  %1456 = vmatpush3.msk.msra.mxu1 %vm276_vm2, %v1657_v8 }
  0x31   :  { %1457 = vmatprep.subr.mxu1 %v1549_v0 }
  0x32   :  { %1458 = vmatpush3.msra.mxu1 %v1670_v11 }
  0x33   :  { %1459 = vmatprep.subr.mxu1 %v1549_v0 }
  0x34   :  { %1460 = vmatpush3.msra.mxu1 %v1677_v13 }
  0x35   :  { %1475 = vmatprep.subr.mxu1 %v1549_v0 }
  0x7f   :  { %v259_v37 = vpop.permute.xlu1 %258 }
  0x80   :  { %v239_v23 = vpop.permute.xlu0 %238 }
  0x84   :  { %v234_v46 = vpop.permute.xlu1 %233 }
  0x85   :  { %v249_v26 = vpop.permute.xlu0 %248 }
  0xc7   :  { %v1735_v28 = vpop.f32.mrf.mxu0 }
  0xc8   :  { %v251_v30 = vmul.f32 %v249_v26, %v1735_v28  ;;  %v241_v31 = vmul.f32 %v239_v23, %v1735_v28  ;;  %v261_v38 = vmul.f32 %v259_v37, %v1735_v28  ;;  %v236_v47 = vmul.f32 %v234_v46, %v1735_v28 }
  0xc9   :  { %v1379_v34 = vpop.f32.mrf.mxu0 }
  0xca   :  { %253 = vrot.lane.b32.xlu0 %v251_v30, %s1555_s16  ;;  %243 = vrot.lane.b32.xlu1 %v241_v31, %s1556_s17 }
  0xce   :  { %263 = vrot.lane.b32.xlu1 %v261_v38, %s1557_s22  ;;  %v346_v41 = vpop.f32.mrf.mxu0 }
  0xd0   :  { %v1423_v45 = vpop.f32.mrf.mxu0 }
  0xef   :  { %v219_v58 = vpop.f32.mrf.mxu1 }
  0xf0   :  { %v1824_v61 = vadd.f32 %v1285_v60, %v219_v58 }
  0xf1   :  { %v1414_v59 = vpop.f32.mrf.mxu1 }
  0xf2   :  { %v1292_v59 = vld [vmem:[%s2109_s11 + $0x8] sm:$0xff] }
  0xf3   :  { %vm688_vm10 = vcmp.gt.f32.partialorder %v1292_v59, 0.0 }
 0x13c   :  { %v244_v48 = vpop.permute.xlu1 %243  ;;  %v254_v50 = vpop.permute.xlu0 %253 }
 0x13d   :  { %v246_v49 = vadd.f32 %v244_v48, %v236_v47 }
 0x13f   :  { %v256_v51 = vadd.f32 %v254_v50, %v246_v49 }
 0x140   :  { %v264_v52 = vpop.permute.xlu1 %263 }
 0x141   :  { %v266_v54 = vadd.f32 %v264_v52, %v256_v51 }
 0x143   :  { %v267_v55 = vadd.f32 %v1808_v53, %v266_v54 }
 0x145   :  { %v350_v56 = vadd.f32 %v346_v41, %v267_v55 }
 0x147   :  { %1525 = vtanh.f32 %v350_v56 }
 0x154   :  { %v1526_v57 = vpop.eup %1525 }
 0x155   :  { %1433 = vmatmul.mubr.msk.f32.vlgmr.msra.gmra.mxu0 %vm356_vm4, %v1526_v57 }
 0x156   :  { %1436 = vmatpush3.msk.msra.mxu0 %vm276_vm2, %v1657_v8  ;;  %1441 = vmatprep.mubr.msk.f32.mxu0 %vm1550_vm0, %v1549_v0 }
 0x157   :  { %1437 = vmatprep.subr.mxu0 %v1549_v0 }
 0x158   :  { %1438 = vmatpush3.msra.mxu0 %v1670_v11 }
 0x159   :  { %1439 = vmatprep.subr.mxu0 %v1549_v0 }
 0x15a   :  { %1440 = vmatpush3.msra.mxu0 %v1677_v13 }
 0x15b   :  { %1444 = vmatprep.subr.mxu0 %v1549_v0 }
 0x215   :  { %v426_v1 = vpop.f32.mrf.mxu0 }
 0x216   :  { %v430_v2 = vadd.f32 %v426_v1, %v1824_v61 }
 0x217   :  { %v1434_v4 = vpop.f32.mrf.mxu0 }
 0x218   :  { %v432_v5 = vsel %vm224_vm5, %v430_v2, -1e+10 }
 0x219   :  { %v1838_v7 = vsel %vm431_vm6, %v432_v5, -3.4028235e+38  ;;  %vm1265_vm6 = vcmask 31744  }
 0x21a   :  { %v434_v9 = vsel %vm272_vm3, %v1838_v7, -inf }
 0x21b   :  { %435 = vmax.xlane.f32.xlu0 %v434_v9 }
 0x2a4   :  { %v1844_v16 = vpop.xlane.xlu0 %435 }
 0x2a5   :  { %vm437_vm7 = vcmp.eq.f32.partialorder %v1838_v7, %v1844_v16 }
 0x2a6   :  { %v438_v17 = vsel %vm437_vm7, %v1842_v15, 20  ;;  %vm1271_vm7 = vcmask 64544  }
 0x2a7   :  { %v439_v18 = vsel %vm272_vm3, %v438_v17, 2147483647 }
 0x2a8   :  { %v441_v19 = vshra.s32 %v439_v18, 16  ;;  %v440_v22 = vand.u32 65535, %v439_v18 }
 0x2aa   :  { %v443_v20 = vcvt.s32.f32 %v441_v19  ;;  %v442_v24 = vcvt.s32.f32 %v440_v22 }
 0x2ac   :  { %444 = vmin.xlane.f32.xlu1 %v443_v20 }
 0x2bd   :  { %518 = vperm.xlu1 %1513, %v1290_v21  }
 0x2c1   :  { %1514 = vset.pattern.permute.xlu1 %v1551_v3 }
 0x2c2   :  { %528 = vperm.xlu1 %1514, %v1290_v21  }
 0x2c6   :  { %1515 = vset.pattern.permute.xlu1 %v1553_v10 }
 0x2c7   :  { %503 = vperm.xlu1 %1515, %v1290_v21  }
 0x2cb   :  { %1516 = vset.pattern.permute.xlu1 %v1554_v12 }
 0x335   :  { %v445_v23 = vpop.xlane.xlu1 %444 }
 0x336   :  { %vm446_vm8 = vcmp.eq.f32.partialorder %v443_v20, %v445_v23  ;;  %v451_v26 = vcvt.f32.s32 %v445_v23  ;;  %v1298_v20 = vld [vmem:[%s2099_s9 + $0x10] sm:$0xff] }
 0x337   :  { %v447_v25 = vsel %vm446_vm8, %v442_v24, inf  ;;  %vm1277_vm8 = vcmask 228416  }
 0x338   :  { %448 = vmin.xlane.f32.xlu0 %v447_v25  ;;  %v452_v29 = vshll.u32 %v451_v26, 16 }
 0x339   :  { %v519_v37 = vpop.permute.xlu1 %518 }
 0x33a   :  { %v521_v41 = vmul.f32 %v519_v37, %v1735_v28 }
 0x33d   :  { %v529_v42 = vpop.permute.xlu1 %528 }
 0x33e   :  { %v531_v44 = vmul.f32 %v529_v42, %v1735_v28 }
 0x342   :  { %v504_v45 = vpop.permute.xlu1 %503 }
 0x343   :  { %v506_v48 = vmul.f32 %v504_v45, %v1735_v28 }
 0x34e   :  { %508 = vperm.xlu0 %1512, %v1290_v21  }
 0x3c1   :  { %v449_v27 = vpop.xlane.xlu0 %448 }
 0x3c2   :  { %v450_v30 = vcvt.f32.s32 %v449_v27 }
 0x3c4   :  { %v1856_v31 = vadd.s32 %v452_v29, %v450_v30 }
 0x3c6   :  { %vm480_vm9 = vcmp.eq.s32.totalorder %v1842_v15, %v1856_v31 }
 0x3c7   :  { %v1864_v34 = vsel %vm480_vm9, 1.0, %v1549_v0 }
 0x3c8   :  { %v538_v36 = vmul.f32 %v1291_v32, %v1864_v34 }
 0x3c9   :  { %v509_v38 = vpop.permute.xlu0 %508 }
 0x3ca   :  { %v511_v39 = vmul.f32 %v509_v38, %v1735_v28  ;;  %1442 = vmatmul.mubr.msk.f32.vlgmr.msra.gmra.mxu0 %vm272_vm3, %v538_v36  ;;  %v1299_v38 = vld [vmem:[%s2102_s10 + $0x10] sm:$0xff] }
 0x3cb   :  { %1445 = vmatpush3.msra.mxu0 %v1749_v33  ;;  %1452 = vmatprep.mubr.msk.f32.mxu0 %vm1550_vm0, %v1549_v0 }
 0x3cc   :  { %513 = vrot.lane.b32.xlu1 %v511_v39, %s1556_s17  ;;  %1446 = vmatprep.subr.mxu0 %v1549_v0 }
 0x3cd   :  { %1447 = vmatpush3.msra.mxu0 %v1756_v35 }
 0x3ce   :  { %1448 = vmatprep.subr.mxu0 %v1549_v0 }
 0x3cf   :  { %1449 = vmatpush3.msra.mxu0 %v1773_v40 }
 0x3d0   :  { %523 = vrot.lane.b32.xlu1 %v521_v41, %s1555_s16  ;;  %1450 = vmatprep.subr.mxu0 %v1549_v0 }
 0x3d1   :  { %1451 = vmatpush3.msra.mxu0 %v1784_v43 }
 0x3d2   :  { %1464 = vmatprep.subr.mxu0 %v1549_v0 }
 0x3d4   :  { %533 = vrot.lane.b32.xlu1 %v531_v44, %s1557_s22 }
 0x43e   :  { %v514_v46 = vpop.permute.xlu1 %513 }
 0x43f   :  { %v516_v49 = vadd.f32 %v514_v46, %v506_v48 }
 0x442   :  { %v524_v47 = vpop.permute.xlu1 %523 }
 0x443   :  { %v526_v51 = vadd.f32 %v524_v47, %v516_v49 }
 0x446   :  { %v534_v50 = vpop.permute.xlu1 %533 }
 0x447   :  { %v536_v52 = vadd.f32 %v534_v50, %v526_v51 }
 0x449   :  { %v537_v54 = vadd.f32 %v1808_v53, %v536_v52 }
 0x48a   :  { %v608_v55 = vpop.f32.mrf.mxu0 }
 0x48b   :  { %v612_v56 = vadd.f32 %v608_v55, %v537_v54 }
 0x48c   :  { %v1443_v57 = vpop.f32.mrf.mxu0 }
 0x48d   :  { %1527 = vtanh.f32 %v612_v56 }
 0x49a   :  { %v1528_v58 = vpop.eup %1527 }
 0x49b   :  { %1453 = vmatmul.mubr.msk.f32.vlgmr.msra.gmra.mxu0 %vm356_vm4, %v1528_v58 }
 0x49c   :  { %1465 = vmatpush3.msra.mxu0 %v1749_v33  ;;  %1472 = vmatprep.mubr.msk.f32.mxu0 %vm1550_vm0, %v1549_v0 }
 0x49d   :  { %1466 = vmatprep.subr.mxu0 %v1549_v0 }
 0x49e   :  { %1467 = vmatpush3.msra.mxu0 %v1756_v35 }
 0x49f   :  { %1468 = vmatprep.subr.mxu0 %v1549_v0 }
 0x4a0   :  { %1469 = vmatpush3.msra.mxu0 %v1773_v40 }
 0x4a1   :  { %1470 = vmatprep.subr.mxu0 %v1549_v0 }
 0x4a2   :  { %1471 = vmatpush3.msra.mxu0 %v1784_v43 }
 0x4a3   :  { %1484 = vmatprep.subr.mxu0 %v1549_v0 }
 0x55b   :  { %v683_v60 = vpop.f32.mrf.mxu0 }
 0x55c   :  { %v687_v63 = vadd.f32 %v683_v60, %v1824_v61 }
 0x55d   :  { %v1454_v1 = vpop.f32.mrf.mxu0 }
 0x55e   :  { %v689_v2 = vsel %vm224_vm5, %v687_v63, -1e+10 }
 0x55f   :  { %v1903_v4 = vsel %vm688_vm10, %v689_v2, -3.4028235e+38 }
 0x560   :  { %v691_v5 = vsel %vm272_vm3, %v1903_v4, -inf }
 0x561   :  { %692 = vmax.xlane.f32.xlu1 %v691_v5 }
 0x5ea   :  { %v1907_v9 = vpop.xlane.xlu1 %692 }
 0x5eb   :  { %vm694_vm11 = vcmp.eq.f32.partialorder %v1903_v4, %v1907_v9 }
 0x5ec   :  { %v695_v14 = vsel %vm694_vm11, %v1842_v15, 20 }
 0x5ed   :  { %v696_v17 = vsel %vm272_vm3, %v695_v14, 2147483647 }
 0x5ee   :  { %v698_v18 = vshra.s32 %v696_v17, 16  ;;  %v697_v21 = vand.u32 65535, %v696_v17 }
 0x5f0   :  { %v700_v19 = vcvt.s32.f32 %v698_v18  ;;  %v699_v23 = vcvt.s32.f32 %v697_v21 }
 0x5f2   :  { %701 = vmin.xlane.f32.xlu0 %v700_v19 }
 0x608   :  { %765 = vperm.xlu0 %1512, %v1298_v20  }
 0x60c   :  { %1518 = vset.pattern.permute.xlu0 %v1553_v10 }
 0x60d   :  { %760 = vperm.xlu0 %1518, %v1298_v20  }
 0x611   :  { %1520 = vset.pattern.permute.xlu0 %v1554_v12 }
 0x67b   :  { %v702_v22 = vpop.xlane.xlu0 %701 }
 0x67c   :  { %vm703_vm12 = vcmp.eq.f32.partialorder %v700_v19, %v702_v22  ;;  %v708_v27 = vcvt.f32.s32 %v702_v22 }
 0x67d   :  { %v704_v24 = vsel %vm703_vm12, %v699_v23, inf }
 0x67e   :  { %705 = vmin.xlane.f32.xlu1 %v704_v24  ;;  %v709_v12 = vshll.u32 %v708_v27, 16 }
 0x683   :  { %v766_v25 = vpop.permute.xlu0 %765 }
 0x684   :  { %v768_v26 = vmul.f32 %v766_v25, %v1735_v28 }
 0x68f   :  { %775 = vperm.xlu1 %1516, %v1298_v20  }
 0x693   :  { %1517 = vset.pattern.permute.xlu1 %v1551_v3 }
 0x694   :  { %785 = vperm.xlu1 %1517, %v1298_v20   ;;  %v711_v20 = vsub.f32 %v1903_v4, %v1907_v9 }
 0x696   :  { %v712_v21 = vmul.f32 1.442695, %v711_v20 }
 0x698   :  { %770 = vrot.lane.b32.xlu1 %v768_v26, %s1556_s17 }
 0x699   :  { %1519 = vset.pattern.permute.xlu1 %v1552_v6 }
 0x707   :  { %v706_v29 = vpop.xlane.xlu1 %705 }
 0x708   :  { %v707_v30 = vcvt.f32.s32 %v706_v29 }
 0x70a   :  { %v1922_v32 = vadd.s32 %v709_v12, %v707_v30 }
 0x70b   :  { %v776_v36 = vpop.permute.xlu1 %775 }
 0x70c   :  { %vm737_vm13 = vcmp.eq.s32.totalorder %v1842_v15, %v1922_v32  ;;  %v778_v37 = vmul.f32 %v776_v36, %v1735_v28 }
 0x70d   :  { %v1297_v39 = vsel %vm737_vm13, 1.0, %v1549_v0 }
 0x70e   :  { %v1932_v41 = vadd.f32 %v1297_v39, %v1864_v34  ;;  %780 = vrot.lane.b32.xlu1 %v778_v37, %s1555_s16  ;;  %v761_v34 = vpop.permute.xlu0 %760 }
 0x70f   :  { %v786_v42 = vpop.permute.xlu1 %785  ;;  %v763_v47 = vmul.f32 %v761_v34, %v1735_v28 }
 0x710   :  { %v795_v44 = vmul.f32 %v1299_v38, %v1932_v41  ;;  %v788_v45 = vmul.f32 %v786_v42, %v1735_v28 }
 0x712   :  { %1462 = vmatmul.mubr.msk.f32.vlgmr.msra.gmra.mxu1 %vm272_vm3, %v795_v44  ;;  %790 = vrot.lane.b32.xlu0 %v788_v45, %s1557_s22 }
 0x713   :  { %1476 = vmatpush3.msk.msra.mxu1 %vm276_vm2, %v1657_v8  ;;  %1481 = vmatprep.mubr.msk.f32.mxu1 %vm1550_vm0, %v1549_v0  ;;  %v771_v46 = vpop.permute.xlu1 %770 }
 0x714   :  { %1477 = vmatprep.subr.mxu1 %v1549_v0  ;;  %v773_v49 = vadd.f32 %v771_v46, %v763_v47 }
 0x715   :  { %1478 = vmatpush3.msra.mxu1 %v1670_v11 }
 0x716   :  { %1479 = vmatprep.subr.mxu1 %v1549_v0 }
 0x717   :  { %1480 = vmatpush3.msra.mxu1 %v1677_v13  ;;  %v1300_v13 = vld [vmem:[%s2109_s11 + $0x10] sm:$0xff] }
 0x718   :  { %vm945_vm14 = vcmp.gt.f32.partialorder %v1300_v13, 0.0  ;;  %v1308_v13 = vld [vmem:[%s2109_s11 + $0x18] sm:$0xff] }
 0x719   :  { %vm1202_vm2 = vcmp.gt.f32.partialorder %v1308_v13, 0.0 }
 0x780   :  { %v781_v48 = vpop.permute.xlu1 %780 }
 0x781   :  { %v783_v51 = vadd.f32 %v781_v48, %v773_v49 }
 0x784   :  { %v791_v50 = vpop.permute.xlu0 %790 }
 0x785   :  { %v793_v8 = vadd.f32 %v791_v50, %v783_v51 }
 0x787   :  { %v794_v52 = vadd.f32 %v1808_v53, %v793_v8 }
 0x7d2   :  { %v865_v54 = vpop.f32.mrf.mxu1 }
 0x7d3   :  { %v869_v55 = vadd.f32 %v865_v54, %v794_v52  ;;  %v2010_v54 = vld [vmem:[%s2110_s12] sm:$0xff] }
 0x7d4   :  { %v1463_v56 = vpop.f32.mrf.mxu1 }
 0x7d5   :  { %1529 = vtanh.f32 %v869_v55 }
 0x7d6   :  { %1531 = vpow2.f32 %v712_v21 }
 0x7e2   :  { %v1530_v11 = vpop.eup %1529 }
 0x7e3   :  { %1473 = vmatmul.mubr.msk.f32.vlgmr.msra.gmra.mxu0 %vm356_vm4, %v1530_v11  ;;  %v1532_v22 = vpop.eup %1531 }
 0x7e4   :  { %1485 = vmatpush3.msra.mxu0 %v1749_v33  ;;  %1492 = vmatprep.mubr.msk.f32.mxu0 %vm1550_vm0, %v1549_v0  ;;  %v714_v23 = vsel %vm272_vm3, %v1532_v22, 0.0 }
 0x7e5   :  { %1486 = vmatprep.subr.mxu0 %v1549_v0 }
 0x7e6   :  { %1487 = vmatpush3.msra.mxu0 %v1756_v35 }
 0x7e7   :  { %1488 = vmatprep.subr.mxu0 %v1549_v0 }
 0x7e8   :  { %1489 = vmatpush3.msra.mxu0 %v1773_v40 }
 0x7e9   :  { %1490 = vmatprep.subr.mxu0 %v1549_v0 }
 0x7ea   :  { %1491 = vmatpush3.msra.mxu0 %v1784_v43  ;;  %v1306_v43 = vld [vmem:[%s2099_s9 + $0x18] sm:$0xff] }
 0x8a3   :  { %v940_v33 = vpop.f32.mrf.mxu0 }
 0x8a4   :  { %v944_v57 = vadd.f32 %v940_v33, %v1824_v61 }
 0x8a5   :  { %v1474_v58 = vpop.f32.mrf.mxu0 }
 0x8a6   :  { %v946_v35 = vsel %vm224_vm5, %v944_v57, -1e+10 }
 0x8a7   :  { %v1965_v59 = vsel %vm945_vm14, %v946_v35, -3.4028235e+38 }
 0x8a8   :  { %v948_v40 = vsel %vm272_vm3, %v1965_v59, -inf }
 0x8a9   :  { %949 = vmax.xlane.f32.xlu1 %v948_v40 }
 0x8ba   :  { %1022 = vperm.xlu1 %1519, %v1306_v43  }
 0x8be   :  { %1521 = vset.pattern.permute.xlu1 %v1551_v3 }
 0x8bf   :  { %1042 = vperm.xlu1 %1521, %v1306_v43  }
 0x8c3   :  { %1522 = vset.pattern.permute.xlu1 %v1553_v10 }
 0x8c4   :  { %1017 = vperm.xlu1 %1522, %v1306_v43  }
 0x8c8   :  { %1523 = vset.pattern.permute.xlu1 %v1552_v6 }
 0x932   :  { %v1975_v60 = vpop.xlane.xlu1 %949 }
 0x933   :  { %vm951_vm15 = vcmp.eq.f32.partialorder %v1965_v59, %v1975_v60  ;;  %v968_v56 = vsub.f32 %v1965_v59, %v1975_v60 }
 0x934   :  { %v952_v63 = vsel %vm951_vm15, %v1842_v15, 20 }
 0x935   :  { %v953_v1 = vsel %vm272_vm3, %v952_v63, 2147483647  ;;  %v969_v11 = vmul.f32 1.442695, %v968_v56 }
 0x936   :  { %v1023_v2 = vpop.permute.xlu1 %1022  ;;  %v955_v5 = vshra.s32 %v953_v1, 16  ;;  %v954_v10 = vand.u32 65535, %v953_v1 }
 0x937   :  { %v1025_v14 = vmul.f32 %v1023_v2, %v1735_v28  ;;  %v472_v2 = vmul.f32 15.0, %v2010_v54 }
 0x938   :  { %v957_v3 = vcvt.s32.f32 %v955_v5  ;;  %v956_v18 = vcvt.s32.f32 %v954_v10  ;;  %v2038_v5 = vld [vmem:[%s2110_s12 + $0x10] sm:$0xff] }
 0x939   :  { %1027 = vrot.lane.b32.xlu1 %v1025_v14, %s1556_s17  ;;  %v980_v14 = vmul.f32 10.0, %v2038_v5  ;;  %v986_v21 = vmul.f32 15.0, %v2038_v5 }
 0x93a   :  { %958 = vmin.xlane.f32.xlu0 %v957_v3  ;;  %v1043_v38 = vpop.permute.xlu1 %1042 }
 0x93b   :  { %v1045_v39 = vmul.f32 %v1043_v38, %v1735_v28 }
 0x93f   :  { %v1018_v42 = vpop.permute.xlu1 %1017 }
 0x9ab   :  { %v1028_v44 = vpop.permute.xlu1 %1027 }
 0x9c3   :  { %v959_v17 = vpop.xlane.xlu0 %958 }
 0x9c4   :  { %vm960_vm0 = vcmp.eq.f32.partialorder %v957_v3, %v959_v17  ;;  %v965_v24 = vcvt.f32.s32 %v959_v17 }
 0x9c5   :  { %v961_v19 = vsel %vm960_vm0, %v956_v18, inf }
 0x9c6   :  { %962 = vmin.xlane.f32.xlu0 %v961_v19  ;;  %v966_v26 = vshll.u32 %v965_v24, 16 }
 0x9dc   :  { %1032 = vperm.xlu0 %1520, %v1306_v43  }
 0x9e0   :  { %1524 = vset.pattern.permute.xlu0 %v1552_v6  ;;  %v1307_v6 = vld [vmem:[%s2102_s10 + $0x18] sm:$0xff] }
 0x9fb   :  { %715 = vadd.xlane.f32.xlu0 %v714_v23 }
 0xa4f   :  { %v963_v25 = vpop.xlane.xlu0 %962 }
 0xa50   :  { %v964_v27 = vcvt.f32.s32 %v963_v25 }
 0xa52   :  { %v1987_v29 = vadd.s32 %v966_v26, %v964_v27  ;;  %v2054_v26 = vld [vmem:[%s2110_s12 + $0x18] sm:$0xff] }
 0xa53   :  { %v1243_v27 = vmul.f32 15.0, %v2054_v26 }
 0xa54   :  { %vm994_vm1 = vcmp.eq.s32.totalorder %v1842_v15, %v1987_v29 }
 0xa55   :  { %v1305_v4 = vsel %vm994_vm1, 1.0, %v1549_v0 }
 0xa56   :  { %v1996_v12 = vadd.f32 %v1305_v4, %v1932_v41  ;;  %v1020_v41 = vmul.f32 %v1018_v42, %v1735_v28 }
 0xa57   :  { %v1033_v30 = vpop.permute.xlu0 %1032 }
 0xa58   :  { %v1052_v36 = vmul.f32 %v1307_v6, %v1996_v12  ;;  %v1035_v37 = vmul.f32 %v1033_v30, %v1735_v28  ;;  %v1030_v34 = vadd.f32 %v1028_v44, %v1020_v41  ;;  %v466_v28 = vmul.f32 10.0, %v2010_v54 }
 0xa5a   :  { %1482 = vmatmul.mubr.msk.f32.vlgmr.msra.gmra.mxu1 %vm272_vm3, %v1052_v36  ;;  %1037 = vrot.lane.b32.xlu1 %v1035_v37, %s1555_s16 }
 0xa5e   :  { %1047 = vrot.lane.b32.xlu1 %v1045_v39, %s1557_s22  ;;  %s1558_s22 = smov 127  }
 0xa5f   :  { %468 = vrot.lane.b32.xlu0 %v466_v28, %s1558_s22  ;;  %v1237_v28 = vmul.f32 10.0, %v2054_v26 }
 0xa84   :  { %v716_v4 = vpop.xlane.xlu0 %715 }
 0xacc   :  { %v1038_v45 = vpop.permute.xlu1 %1037 }
 0xacd   :  { %v1040_v47 = vadd.f32 %v1038_v45, %v1030_v34 }
 0xad0   :  { %v1048_v46 = vpop.permute.xlu1 %1047 }
 0xad1   :  { %v1050_v48 = vadd.f32 %v1048_v46, %v1040_v47  ;;  %v469_v36 = vpop.permute.xlu0 %468  ;;  %v735_v46 = vcvt.s32.f32 %v1922_v32 }
 0xad3   :  { %v1051_v49 = vadd.f32 %v1808_v53, %v1050_v48  ;;  %v454_v53 = vsub.f32 %v1838_v7, %v1844_v16 }
 0xad5   :  { %v455_v55 = vmul.f32 1.442695, %v454_v53 }
 0xb1a   :  { %v1122_v50 = vpop.f32.mrf.mxu1 }
 0xb1b   :  { %v1126_v51 = vadd.f32 %v1122_v50, %v1051_v49  ;;  %v464_v49 = vmul.f32 5.0, %v2010_v54 }
 0xb1c   :  { %v1483_v8 = vpop.f32.mrf.mxu1 }
 0xb1d   :  { %1533 = vtanh.f32 %v1126_v51  ;;  %v471_v51 = vadd.f32 %v469_v36, %v464_v49  ;;  %v978_v8 = vmul.f32 5.0, %v2038_v5 }
 0xb1e   :  { %1535 = vpow2.f32 %v455_v55 }
 0xb1f   :  { %1537 = vpow2.f32 %v969_v11  ;;  %v478_v11 = vcvt.s32.f32 %v1856_v31 }
 0xb2a   :  { %v1534_v52 = vpop.eup %1533 }
 0xb2b   :  { %1493 = vmatmul.mubr.msk.f32.vlgmr.msra.gmra.mxu0 %vm356_vm4, %v1534_v52  ;;  %v1536_v43 = vpop.eup %1535 }
 0xb2c   :  { %v457_v59 = vsel %vm272_vm3, %v1536_v43, 0.0  ;;  %v1538_v63 = vpop.eup %1537 }
 0xb2d   :  { %v971_v1 = vsel %vm272_vm3, %v1538_v63, 0.0 }
 0xbeb   :  { %v1197_v33 = vpop.f32.mrf.mxu0 }
 0xbec   :  { %v1201_v57 = vadd.f32 %v1197_v33, %v1824_v61  ;;  %v2030_v61 = vld [vmem:[%s2110_s12 + $0x8] sm:$0xff]  ;;  %v992_v33 = vcvt.s32.f32 %v1987_v29  ;;  %s1560_s12 = smov 4  }
 0xbed   :  { %v1494_v58 = vpop.f32.mrf.mxu0  ;;  %v723_v62 = vmul.f32 10.0, %v2030_v61  ;;  %v729_v20 = vmul.f32 15.0, %v2030_v61  ;;  %v721_v38 = vmul.f32 5.0, %v2030_v61 }
 0xbee   :  { %v1203_v35 = vsel %vm224_vm5, %v1201_v57, -1e+10 }
 0xbef   :  { %v1204_v7 = vsel %vm1202_vm2, %v1203_v35, -3.4028235e+38 }
 0xbf0   :  { %v1205_v40 = vsel %vm272_vm3, %v1204_v7, -inf }
 0xbf1   :  { %1206 = vmax.xlane.f32.xlu1 %v1205_v40 }
 0xbf5   :  { %458 = vadd.xlane.f32.xlu1 %v457_v59 }
 0xbf9   :  { %972 = vadd.xlane.f32.xlu1 %v971_v1 }
 0xc0a   :  { %725 = vrot.lane.b32.xlu1 %v723_v62, %s1558_s22 }
 0xc0e   :  { %474 = vrot.lane.b32.xlu1 %v472_v2, %s1559_s5 }
 0xc12   :  { %982 = vrot.lane.b32.xlu1 %v980_v14, %s1558_s22 }
 0xc7a   :  { %v2042_v3 = vpop.xlane.xlu1 %1206 }
 0xc7b   :  { %vm1208_vm4 = vcmp.eq.f32.partialorder %v1204_v7, %v2042_v3  ;;  %v1225_v22 = vsub.f32 %v1204_v7, %v2042_v3 }
 0xc7c   :  { %v1209_v10 = vsel %vm1208_vm4, %v1842_v15, 20 }
 0xc7d   :  { %v1210_v17 = vsel %vm272_vm3, %v1209_v10, 2147483647  ;;  %v1226_v23 = vmul.f32 1.442695, %v1225_v22 }
 0xc7e   :  { %v1212_v18 = vshra.s32 %v1210_v17, 16  ;;  %v459_v6 = vpop.xlane.xlu1 %458  ;;  %v1211_v37 = vand.u32 65535, %v1210_v17 }
 0xc7f   :  { %1539 = vpow2.f32 %v1226_v23 }
 0xc80   :  { %v1214_v19 = vcvt.s32.f32 %v1212_v18  ;;  %v1213_v44 = vcvt.s32.f32 %v1211_v37  ;;  %1541 = vlog2.f32 %v459_v6 }
 0xc81   :  { %1543 = vlog2.f32 %v716_v4  ;;  %v1235_v4 = vmul.f32 5.0, %v2054_v26 }
 0xc82   :  { %1215 = vmin.xlane.f32.xlu0 %v1214_v19  ;;  %v973_v30 = vpop.xlane.xlu1 %972 }
 0xc83   :  { %1545 = vlog2.f32 %v973_v30 }
 0xc86   :  { %v726_v39 = vpop.permute.xlu1 %725 }
 0xc87   :  { %v728_v45 = vadd.f32 %v726_v39, %v721_v38 }
 0xc8a   :  { %v475_v50 = vpop.permute.xlu1 %474 }
 0xc8b   :  { %v477_v53 = vadd.f32 %v475_v50, %v471_v51 }
 0xc8c   :  { %v1540_v24 = vpop.eup %1539 }
 0xc8d   :  { %v1228_v25 = vsel %vm272_vm3, %v1540_v24, 0.0  ;;  %v479_v32 = vsub.f32 %v478_v11, %v477_v53  ;;  %v1542_v58 = vpop.eup %1541 }
 0xc8e   :  { %v983_v52 = vpop.permute.xlu1 %982  ;;  %v1544_v7 = vpop.eup %1543  ;;  %v461_v43 = vmul.f32 0.6931472, %v1542_v58 }
 0xc8f   :  { %v985_v55 = vadd.f32 %v983_v52, %v978_v8  ;;  %v718_v59 = vmul.f32 0.6931472, %v1544_v7 }
 0xc90   :  { %v1546_v40 = vpop.eup %1545  ;;  %v462_v63 = vadd.f32 %v461_v43, %v1844_v16 }
 0xc91   :  { %v975_v31 = vmul.f32 0.6931472, %v1546_v40  ;;  %v719_v1 = vadd.f32 %v718_v59, %v1907_v9 }
 0xc92   :  { %v463_v62 = vsub.f32 %v1844_v16, %v462_v63 }
 0xc93   :  { %v976_v29 = vadd.f32 %v975_v31, %v1975_v60  ;;  %v720_v2 = vsub.f32 %v1907_v9, %v719_v1 }
 0xc94   :  { %v491_v18 = vmul.f32 %v463_v62, %v2010_v54 }
 0xc95   :  { %v977_v14 = vsub.f32 %v1975_v60, %v976_v29 }
 0xc98   :  { %731 = vrot.lane.b32.xlu0 %v729_v20, %s1559_s5  ;;  %v748_v20 = vmul.f32 %v2030_v61, %v720_v2 }
 0xc9a   :  { %v749_v22 = vadd.f32 %v748_v20, %v491_v18 }
 0xc9c   :  { %988 = vrot.lane.b32.xlu0 %v986_v21, %s1559_s5  ;;  %v1005_v21 = vmul.f32 %v2038_v5, %v977_v14 }
 0xc9e   :  { %v1006_v24 = vadd.f32 %v1005_v21, %v749_v22 }
 0xcbb   :  { %1229 = vadd.xlane.f32.xlu0 %v1228_v25 }
 0xcd1   :  { %1245 = vrot.lane.b32.xlu0 %v1243_v27, %s1559_s5 }
 0xd0b   :  { %v1216_v42 = vpop.xlane.xlu0 %1215 }
 0xd0c   :  { %vm1217_vm3 = vcmp.eq.f32.partialorder %v1214_v19, %v1216_v42  ;;  %v1222_v9 = vcvt.f32.s32 %v1216_v42 }
 0xd0d   :  { %v1218_v41 = vsel %vm1217_vm3, %v1213_v44, inf }
 0xd0e   :  { %1219 = vmin.xlane.f32.xlu1 %v1218_v41  ;;  %v1223_v27 = vshll.u32 %v1222_v9, 16 }
 0xd0f   :  { %v732_v34 = vpop.permute.xlu0 %731 }
 0xd10   :  { %v734_v47 = vadd.f32 %v732_v34, %v728_v45 }
 0xd12   :  { %v736_v48 = vsub.f32 %v735_v46, %v734_v47 }
 0xd13   :  { %v989_v56 = vpop.permute.xlu0 %988 }
 0xd14   :  { %743 = vperm.xlu0 %1524, %v736_v48   ;;  %v991_v13 = vadd.f32 %v989_v56, %v985_v55 }
 0xd16   :  { %v993_v57 = vsub.f32 %v992_v33, %v991_v13 }
 0xd1f   :  { %1239 = vrot.lane.b32.xlu1 %v1237_v28, %s1558_s22 }
 0xd23   :  { %486 = vperm.xlu1 %1523, %v479_v32  }
 0xd27   :  { %1000 = vperm.xlu1 %1523, %v993_v57  }
 0xd44   :  { %v1230_v35 = vpop.xlane.xlu0 %1229 }
 0xd45   :  { %1547 = vlog2.f32 %v1230_v35 }
 0xd48   :  { %v1246_v38 = vpop.permute.xlu0 %1245 }
 0xd52   :  { %v1548_v10 = vpop.eup %1547 }
 0xd53   :  { %v1232_v17 = vmul.f32 0.6931472, %v1548_v10 }
 0xd55   :  { %v1233_v19 = vadd.f32 %v1232_v17, %v2042_v3 }
 0xd57   :  { %v1234_v23 = vsub.f32 %v2042_v3, %v1233_v19 }
 0xd59   :  { %v1262_v16 = vmul.f32 %v2054_v26, %v1234_v23 }
 0xd5b   :  { %v1263_v25 = vadd.f32 %v1262_v16, %v1006_v24 }
 0xd5d   :  { %1268 = vrot.lane.b32.xlu0 %v1263_v25, %s1560_s12 }
 0xd8f   :  { %v744_v34 = vpop.permute.xlu0 %743 }
 0xd97   :  { %v1220_v60 = vpop.xlane.xlu1 %1219 }
 0xd98   :  { %v1221_v6 = vcvt.f32.s32 %v1220_v60 }
 0xd9a   :  { %v1224_v30 = vadd.s32 %v1223_v27, %v1221_v6 }
 0xd9b   :  { %v1240_v36 = vpop.permute.xlu1 %1239 }
 0xd9c   :  { %v1242_v37 = vadd.f32 %v1240_v36, %v1235_v4  ;;  %v1249_v39 = vcvt.s32.f32 %v1224_v30  ;;  %vm1251_vm5 = vcmp.eq.s32.totalorder %v1842_v15, %v1224_v30  ;;  %v746_v15 = vmul.f32 %v2030_v61, %v744_v34 }
 0xd9d   :  { %v1313_v45 = vsel %vm1251_vm5, 1.0, %v1549_v0 }
 0xd9e   :  { %v1248_v3 = vadd.f32 %v1246_v38, %v1242_v37  ;;  %v1254_v42 = vadd.f32 %v1313_v45, %v1996_v12 }
 0xd9f   :  { %v487_v41 = vpop.permute.xlu1 %486 }
 0xda0   :  { %v1250_v44 = vsub.f32 %v1249_v39, %v1248_v3  ;;  %v489_v47 = vmul.f32 %v487_v41, %v2010_v54 }
 0xda2   :  { %1257 = vperm.xlu1 %1523, %v1250_v44   ;;  %v747_v49 = vadd.f32 %v746_v15, %v489_v47 }
 0xda3   :  { %v1001_v46 = vpop.permute.xlu1 %1000 }
 0xda4   :  { %v1003_v48 = vmul.f32 %v2038_v5, %v1001_v46 }
 0xda6   :  { %1274 = vrot.lane.b32.xlu1 %v1254_v42, %s1561_s8  ;;  %v1004_v51 = vadd.f32 %v1003_v48, %v747_v49 }
 0xdcf   :  { %v1269_v12 = vpop.permute.xlu0 %1268 }
 0xe1d   :  { %v1258_v50 = vpop.permute.xlu1 %1257 }
 0xe1e   :  { %v1260_v8 = vmul.f32 %v2054_v26, %v1258_v50 }
 0xe20   :  { %v1261_v0 = vadd.f32 %v1260_v8, %v1004_v51 }
 0xe21   :  { %v1275_v54 = vpop.permute.xlu1 %1274 }
 0xe22   :  { %1266 = vst.msk [vmem:[%s2111_s13] sm:$0xff] %vm1265_vm6, %v1261_v0 }
 0xe23   :  { %1272 = vst.msk [vmem:[%s2111_s13] sm:$0xff] %vm1271_vm7, %v1269_v12 }
 0xe24   :  { %1278 = vst.msk [vmem:[%s2111_s13] sm:$0xff] %vm1277_vm8, %v1275_v54 }

</bundles_post_ra>
